<compile_context>
chip_gen: v6e
topology: v6e:2x2x1
jax: 0.10.0
libtpu: 0.0.40
codegen_flags: <defaults>
</compile_context>

<pallas_src>
import functools

import numpy as np
import jax
import jax.numpy as jnp
from jax.experimental import pallas as pl
from jax.experimental.pallas import tpu as pltpu


_PARAM_CONVTRANS = {
    2: dict(kernel=3, stride=2, padding=1, out_padding=1),
    4: dict(kernel=5, stride=4, padding=1, out_padding=1),
}

_LANE = 128
_VMEM_LIMIT = 32 * 1024 * 1024


def _round_up(x, m):
    return (x + m - 1) // m * m


# -----------------------------------------------------------------------------
# Pallas kernels
# -----------------------------------------------------------------------------
def _linear_relu_kernel(x_ref, w_ref, b_ref, o_ref):
    y = jnp.dot(x_ref[...], w_ref[...], preferred_element_type=jnp.float32)
    o_ref[...] = jnp.maximum(y + b_ref[...], 0.0)


def linear_relu(x, w, b):
    # Tiny (B x latent) @ (latent x C*H*W): single block, whole-array VMEM.
    B, out_dim = x.shape[0], w.shape[1]
    return pl.pallas_call(
        _linear_relu_kernel,
        out_shape=jax.ShapeDtypeStruct((B, out_dim), jnp.float32),
        in_specs=[pl.BlockSpec(memory_space=pltpu.MemorySpace.VMEM)] * 3,
        out_specs=pl.BlockSpec(memory_space=pltpu.MemorySpace.VMEM),
    )(x, w, b)


def _convt_bn_act_kernel(p_ref, w_ref, b_ref, g_ref, bt_ref, m_ref, mt_ref,
                         o_ref, s1_ref, s2_ref, sc_ref, sh_ref,
                         *, rows, tile_r, act, eps, count):
    """Fused sub-pixel ConvTranspose GEMM + batch-stat BatchNorm + activation.

    grid = (phase, row_tile); phase 0 accumulates per-channel batch statistics,
    phase 1 recomputes the GEMM and writes the normalized/activated output.
    """
    ph = pl.program_id(0)
    t = pl.program_id(1)

    # GEMM (bf16 MXU feed, f32 accumulation).  Recomputed in both phases: the
    # contraction dim K is tiny, so this is cheaper than a y HBM round-trip.
    y = jnp.dot(w_ref[...], p_ref[...], preferred_element_type=jnp.float32)
    y = y + b_ref[...]                                   # (cout_pad, tile_r)

    @pl.when(jnp.logical_and(ph == 0, t == 0))
    def _init():
        s1_ref[...] = jnp.zeros_like(s1_ref)
        s2_ref[...] = jnp.zeros_like(s2_ref)

    @pl.when(ph == 0)
    def _stats():
        # Mask rows that are pure padding so they do not pollute batch stats.
        col = jax.lax.broadcasted_iota(jnp.int32, y.shape, 1) + t * tile_r
        ym = jnp.where(col < rows, y, 0.0)
        s1_ref[...] += jnp.sum(ym, axis=1, keepdims=True)
        s2_ref[...] += jnp.sum(ym * ym, axis=1, keepdims=True)

    @pl.when(jnp.logical_and(ph == 1, t == 0))
    def _finalize_stats():
        # Fold the s^2 pixel-shuffle phases into real output channels with tiny
        # 0/1 selector matmuls (layout-robust), then build scale/shift.
        tot1 = jnp.dot(m_ref[...], s1_ref[...],
                       preferred_element_type=jnp.float32)     # (co_pad, 1)
        tot2 = jnp.dot(m_ref[...], s2_ref[...],
                       preferred_element_type=jnp.float32)
        mean = tot1 / count
        var = jnp.maximum(tot2 / count - mean * mean, 0.0)
        inv_std = jax.lax.rsqrt(var + eps)
        scale = g_ref[...] * inv_std
        shift = bt_ref[...] - mean * scale
        sc_ref[...] = jnp.dot(mt_ref[...], scale,
                              preferred_element_type=jnp.float32)  # (cout_pad,1)
        sh_ref[...] = jnp.dot(mt_ref[...], shift,
                              preferred_element_type=jnp.float32)

    @pl.when(ph == 1)
    def _normalize():
        z = y * sc_ref[...] + sh_ref[...]
        if act == "relu":
            z = jnp.maximum(z, 0.0)
        else:  # sigmoid (last layer)
            z = jax.nn.sigmoid(z)
        o_ref[...] = z.astype(o_ref.dtype)


# -----------------------------------------------------------------------------
# Sub-pixel (pixel-shuffle) decomposition of ConvTranspose2d  (trace-time glue)
# -----------------------------------------------------------------------------
def _subpixel_plan(k, s, p):
    """For each output phase r in [0, s): list of (input_offset, kernel_tap) so
    that   out[r + s*q] = sum_taps  x[q + offset] * w[tap]."""
    taps, offs = [], []
    for r in range(s):
        t = []
        for ky in range(k):
            if (ky - r - p) % s == 0:
                m = (ky - r - p) // s
                t.append((-m, ky))
        taps.append(t)
        offs += [o for o, _ in t]
    lo, hi = min(offs), max(offs)
    return taps, lo, hi


def convtranspose_bn_act(x_cnhw, w_t, conv_b, gamma, beta, *, k, s, p, op, act,
                         eps=1e-5, tile_r_target=2048):
    ci, n, h_in, w_in = x_cnhw.shape
    co = w_t.shape[1]
    h_out = (h_in - 1) * s - 2 * p + k + op
    w_out = (w_in - 1) * s - 2 * p + k + op

    taps, lo, hi = _subpixel_plan(k, s, p)
    wsz = hi - lo + 1                                   # window size (2 here)
    qh_all = [-(-(h_out - r) // s) for r in range(s)]
    qw_all = [-(-(w_out - r) // s) for r in range(s)]
    qh, qw = qh_all[0], qw_all[0]
    # Supported configs (pool2 / pool4 of the reference module) give uniform phases.
    assert all(q == qh for q in qh_all) and all(q == qw for q in qw_all)
    assert qh * s == h_out and qw * s == w_out

    # Pad input so every x[q + off] access (off in [lo, hi]) is in range.
    pad_l = max(0, -lo)
    pad_hh = max(0, qh + hi - h_in)
    pad_hw = max(0, qw + hi - w_in)
    xp = jnp.pad(x_cnhw.astype(jnp.bfloat16),
                 ((0, 0), (0, 0), (pad_l, pad_hh), (pad_l, pad_hw)))
    start = lo + pad_l

    # im2col over the small (wsz x wsz) window of the *un-dilated* input.
    # TODO(synk): fuse this window extraction into the GEMM kernel (in-kernel
    # slicing of a VMEM-resident activation) to avoid materializing patches in HBM.
    cols = [xp[:, :, start + jy:start + jy + qh, start + jx:start + jx + qw]
            for jy in range(wsz) for jx in range(wsz)]
    patches = jnp.stack(cols, axis=1)                   # (Ci, wsz^2, N, qh, qw) bf16
    rows = n * qh * qw
    k_dim = ci * wsz * wsz
    patches_t = patches.reshape(k_dim, rows)

    # Fused weight: rows = (ry, rx, co), cols = (ci, jy, jx); zeros for unused taps.
    w_sub = jnp.zeros((s, s, co, ci, wsz, wsz), jnp.float32)
    for ry, taps_y in enumerate(taps):
        for off_y, ky in taps_y:
            for rx, taps_x in enumerate(taps):
                for off_x, kx in taps_x:
                    w_sub = w_sub.at[ry, rx, :, :, off_y - lo, off_x - lo].set(
                        w_t[:, :, ky, kx].T)
    s2 = s * s
    cout = s2 * co
    w_mat_t = w_sub.reshape(cout, k_dim)

    # TPU-friendly padding: rows -> lane multiples, K / cout -> sublane multiples.
    k_pad = _round_up(k_dim, 16)
    cout_pad = _round_up(cout, 16)
    co_pad = _round_up(co, 8)
    tile_r = min(tile_r_target, _round_up(rows, _LANE))
    rows_pad = _round_up(rows, tile_r)
    num_tiles = rows_pad // tile_r

    patches_t = jnp.pad(patches_t, ((0, k_pad - k_dim), (0, rows_pad - rows)))
    w_mat_t = jnp.pad(w_mat_t, ((0, cout_pad - cout), (0, k_pad - k_dim)))
    w_mat_t = w_mat_t.astype(jnp.bfloat16)

    bias_full = jnp.tile(conv_b[None, :], (s2, 1)).reshape(cout)
    bias_full = jnp.pad(bias_full, (0, cout_pad - cout)).reshape(cout_pad, 1)
    bias_full = bias_full.astype(jnp.float32)
    gamma_p = jnp.pad(gamma.astype(jnp.float32), (0, co_pad - co)).reshape(co_pad, 1)
    beta_p = jnp.pad(beta.astype(jnp.float32), (0, co_pad - co)).reshape(co_pad, 1)

    # 0/1 selector matrices: m folds (phase, co) stats -> per-co; m^T broadcasts
    # per-co scale/shift back to the (phase, co) GEMM channel layout.
    m_np = np.zeros((co_pad, cout_pad), np.float32)
    for ph_ in range(s2):
        m_np[np.arange(co), ph_ * co + np.arange(co)] = 1.0
    m_sel = jnp.asarray(m_np)
    mt_sel = jnp.asarray(np.ascontiguousarray(m_np.T))

    out_dtype = jnp.bfloat16 if act == "relu" else jnp.float32
    count = float(s2 * rows)                            # N * H_out * W_out

    kernel = functools.partial(_convt_bn_act_kernel, rows=rows, tile_r=tile_r,
                               act=act, eps=eps, count=count)
    z_t = pl.pallas_call(
        kernel,
        out_shape=jax.ShapeDtypeStruct((cout_pad, rows_pad), out_dtype),
        grid=(2, num_tiles),                            # (phase, row tile)
        in_specs=[
            pl.BlockSpec((k_pad, tile_r), lambda ph, t: (0, t)),      # patches
            pl.BlockSpec((cout_pad, k_pad), lambda ph, t: (0, 0)),    # weights
            pl.BlockSpec((cout_pad, 1), lambda ph, t: (0, 0)),        # conv bias
            pl.BlockSpec((co_pad, 1), lambda ph, t: (0, 0)),          # gamma
            pl.BlockSpec((co_pad, 1), lambda ph, t: (0, 0)),          # beta
            pl.BlockSpec((co_pad, cout_pad), lambda ph, t: (0, 0)),   # phase-sum sel
            pl.BlockSpec((cout_pad, co_pad), lambda ph, t: (0, 0)),   # broadcast sel
        ],
        # Output block index only advances during phase 1 -> no garbage writebacks
        # while statistics are being accumulated.
        out_specs=pl.BlockSpec((cout_pad, tile_r), lambda ph, t: (0, ph * t)),
        scratch_shapes=[pltpu.VMEM((cout_pad, 1), jnp.float32)] * 4,
        compiler_params=pltpu.CompilerParams(
            dimension_semantics=("arbitrary", "arbitrary"),
            vmem_limit_bytes=_VMEM_LIMIT),
    )(patches_t, w_mat_t, bias_full, gamma_p, beta_p, m_sel, mt_sel)

    # Un-pad + pixel-shuffle the s*s phases back to (C_out, N, H_out, W_out).
    z = z_t[:cout, :rows].reshape(s, s, co, n, qh, qw)
    z = z.transpose(2, 3, 4, 0, 5, 1).reshape(co, n, h_out, w_out)
    return z


# -----------------------------------------------------------------------------
# Decoder forward
# -----------------------------------------------------------------------------
def decoder_forward(params, x, *, enc_channel, enc_size, channels, pool_sizes,
                    eps=1e-5):
    n = x.shape[0]
    h = linear_relu(x, params["lin_w"], params["lin_b"])
    # Carry activations as (C, N, H, W) between layers (no per-layer NCHW transposes).
    h = h.reshape(n, enc_channel, enc_size, enc_size).transpose(1, 0, 2, 3)
    for i, _ in enumerate(channels):
        cfg = _PARAM_CONVTRANS[pool_sizes[i]]
        act = "relu" if i + 1 < len(channels) else "sigmoid"
        h = convtranspose_bn_act(
            h, params[f"conv{i}_w"], params[f"conv{i}_b"],
            params[f"bn{i}_g"], params[f"bn{i}_b"],
            k=cfg["kernel"], s=cfg["stride"], p=cfg["padding"],
            op=cfg["out_padding"], act=act, eps=eps)
    return h.transpose(1, 0, 2, 3)                      # back to NCHW once, at the end


# -----------------------------------------------------------------------------
# Pure-JAX reference (dilated-conv formulation) for a numerical self-check
# -----------------------------------------------------------------------------
def reference_decoder(params, x, *, enc_channel, enc_size, channels, pool_sizes,
                      eps=1e-5):
    n = x.shape[0]
    h = jnp.maximum(x @ params["lin_w"] + params["lin_b"], 0.0)
    h = h.reshape(n, enc_channel, enc_size, enc_size)
    for i, ch in enumerate(channels):
        cfg = _PARAM_CONVTRANS[pool_sizes[i]]
        k, s, p, op = cfg["kernel"], cfg["stride"], cfg["padding"], cfg["out_padding"]
        w_t = params[f"conv{i}_w"]
        wc = jnp.flip(w_t, (2, 3)).transpose(1, 0, 2, 3)        # (Co, Ci, k, k)
        pad_lo, pad_hi = k - 1 - p, k - 1 - p + op
        y = jax.lax.conv_general_dilated(
            h, wc, window_strides=(1, 1),
            padding=[(pad_lo, pad_hi), (pad_lo, pad_hi)],
            lhs_dilation=(s, s),
            dimension_numbers=("NCHW", "OIHW", "NCHW"))
        y = y + params[f"conv{i}_b"].reshape(1, ch, 1, 1)
        mean = y.mean(axis=(0, 2, 3), keepdims=True)
        var = jnp.mean((y - mean) ** 2, axis=(0, 2, 3), keepdims=True)
        z = (params[f"bn{i}_g"].reshape(1, ch, 1, 1) * (y - mean)
             * jax.lax.rsqrt(var + eps) + params[f"bn{i}_b"].reshape(1, ch, 1, 1))
        h = jnp.maximum(z, 0.0) if i + 1 < len(channels) else jax.nn.sigmoid(z)
    return h


# -----------------------------------------------------------------------------
# Deterministic parameter init (shapes follow the PyTorch module's __init__)
# -----------------------------------------------------------------------------
def init_params(key, *, latent_dim, enc_channel, enc_size, channels, pool_sizes):
    params = {}
    lin_out = enc_channel * enc_size * enc_size
    keys = jax.random.split(key, 2 + 4 * len(channels))
    params["lin_w"] = 0.1 * jax.random.normal(keys[0], (latent_dim, lin_out), jnp.float32)
    params["lin_b"] = 0.1 * jax.random.normal(keys[1], (1, lin_out), jnp.float32)
    prev = enc_channel
    for i, ch in enumerate(channels):
        k = _PARAM_CONVTRANS[pool_sizes[i]]["kernel"]
        kw, kb, kg, kbt = keys[2 + 4 * i: 6 + 4 * i]
        params[f"conv{i}_w"] = 0.1 * jax.random.normal(kw, (prev, ch, k, k), jnp.float32)
        params[f"conv{i}_b"] = 0.1 * jax.random.normal(kb, (ch,), jnp.float32)
        params[f"bn{i}_g"] = 1.0 + 0.1 * jax.random.normal(kg, (ch,), jnp.float32)
        params[f"bn{i}_b"] = 0.1 * jax.random.normal(kbt, (ch,), jnp.float32)
        prev = ch
    return params


if __name__ == "__main__":
    # Small config: Decoder(enc_channel=8, enc_size=4, channels=[8, 4],
    #                       latent_dim=16, pool_sizes=[2, 2, 2, 2])
    B = 2
    latent_dim = 16
    enc_channel = 8
    enc_size = 4
    channels = (8, 4)
    pool_sizes = (2, 2, 2, 2)

    key = jax.random.PRNGKey(0)
    kx, kp = jax.random.split(key)
    x = jax.random.normal(kx, (B, latent_dim), jnp.float32)
    params = init_params(kp, latent_dim=latent_dim, enc_channel=enc_channel,
                         enc_size=enc_size, channels=channels,
                         pool_sizes=pool_sizes)

    fwd = jax.jit(functools.partial(
        decoder_forward, enc_channel=enc_channel, enc_size=enc_size,
        channels=channels, pool_sizes=pool_sizes))
    out = jax.block_until_ready(fwd(params, x))

    # 4 -> 8 -> 16 spatial upsampling; final channels = channels[-1]
    assert out.shape == (B, channels[-1], 16, 16), out.shape
    assert bool(jnp.all(jnp.isfinite(out)))
    assert bool(jnp.all((out >= 0.0) & (out <= 1.0)))   # sigmoid output range

    # Cross-check against a pure-JAX reference of the PyTorch module (bf16 MXU
    # inputs / bf16 intermediate activations in the Pallas path -> loose tolerance).
    ref = reference_decoder(params, x, enc_channel=enc_channel,
                            enc_size=enc_size, channels=channels,
                            pool_sizes=pool_sizes)
    assert bool(jnp.max(jnp.abs(out - ref)) < 5e-2)

    print("KERNEL_OK")
</pallas_src>

<mosaic_0001>
module attributes {stable_mosaic.version = 11 : i64} {
  func.func @_linear_relu_kernel(%arg0: memref<2x16xf32, #tpu.memory_space<vmem>>, %arg1: memref<16x128xf32, #tpu.memory_space<vmem>>, %arg2: memref<1x128xf32, #tpu.memory_space<vmem>>, %arg3: memref<2x128xf32, #tpu.memory_space<vmem>>) attributes {dimension_semantics = [], scalar_prefetch = 0 : i64, scratch_operands = 0 : i64, tpu.core_type = #tpu.core_type<tc>} {
    %c0 = arith.constant 0 : index
    %c0_0 = arith.constant 0 : index
    %0 = vector.load %arg0[%c0, %c0_0] : memref<2x16xf32, #tpu.memory_space<vmem>>, vector<2x16xf32>
    %c0_1 = arith.constant 0 : index
    %c0_2 = arith.constant 0 : index
    %1 = vector.load %arg1[%c0_1, %c0_2] : memref<16x128xf32, #tpu.memory_space<vmem>>, vector<16x128xf32>
    %cst = arith.constant dense<0.000000e+00> : vector<2x128xf32>
    %2 = tpu.matmul %0, %1, %cst {dimension_numbers = #tpu.dot_dimension_numbers<[1], [0], [0], [1], [0, 0, 1, 1], [], []>} : vector<2x16xf32>, vector<16x128xf32>, vector<2x128xf32> -> vector<2x128xf32>
    %c0_3 = arith.constant 0 : index
    %c0_4 = arith.constant 0 : index
    %3 = vector.load %arg2[%c0_3, %c0_4] : memref<1x128xf32, #tpu.memory_space<vmem>>, vector<1x128xf32>
    %4 = vector.broadcast %3 : vector<1x128xf32> to vector<2x128xf32>
    %5 = arith.addf %2, %4 : vector<2x128xf32>
    %cst_5 = arith.constant 0.000000e+00 : f32
    %6 = vector.broadcast %cst_5 : f32 to vector<2x128xf32>
    %7 = arith.maximumf %5, %6 : vector<2x128xf32>
    %c0_6 = arith.constant 0 : index
    %c0_7 = arith.constant 0 : index
    %8 = vector.load %arg3[%c0_6, %c0_7] : memref<2x128xf32, #tpu.memory_space<vmem>>, vector<2x128xf32>
    tpu.vector_store %arg3[%c0_6, %c0_7], %7 {strides = array<i32>} : memref<2x128xf32, #tpu.memory_space<vmem>>, vector<2x128xf32>,
    return
  }
}

module attributes {stable_mosaic.version = 11 : i64} {
  func.func @_convt_bn_act_kernel(%arg0: i32, %arg1: i32, %arg2: memref<32x128xbf16, #tpu.memory_space<vmem>>, %arg3: memref<32x32xbf16, #tpu.memory_space<vmem>>, %arg4: memref<32x1xf32, #tpu.memory_space<vmem>>, %arg5: memref<8x1xf32, #tpu.memory_space<vmem>>, %arg6: memref<8x1xf32, #tpu.memory_space<vmem>>, %arg7: memref<8x32xf32, #tpu.memory_space<vmem>>, %arg8: memref<32x8xf32, #tpu.memory_space<vmem>>, %arg9: memref<32x128xbf16, #tpu.memory_space<vmem>>, %arg10: memref<32x1xf32, #tpu.memory_space<vmem>>, %arg11: memref<32x1xf32, #tpu.memory_space<vmem>>, %arg12: memref<32x1xf32, #tpu.memory_space<vmem>>, %arg13: memref<32x1xf32, #tpu.memory_space<vmem>>) attributes {dimension_semantics = [#tpu.dimension_semantics<arbitrary>, #tpu.dimension_semantics<arbitrary>], iteration_bounds = array<i64: 2, 1>, scalar_prefetch = 0 : i64, scratch_operands = 4 : i64, tpu.core_type = #tpu.core_type<tc>, window_params = [{transform_indices = @transform_0, window_bounds = array<i64: 32, 128>}, {pipeline_mode = #tpu.pipeline_mode<synchronous>, transform_indices = @transform_1, window_bounds = array<i64: 32, 32>}, {pipeline_mode = #tpu.pipeline_mode<synchronous>, transform_indices = @transform_2, window_bounds = array<i64: 32, 1>}, {pipeline_mode = #tpu.pipeline_mode<synchronous>, transform_indices = @transform_3, window_bounds = array<i64: 8, 1>}, {pipeline_mode = #tpu.pipeline_mode<synchronous>, transform_indices = @transform_4, window_bounds = array<i64: 8, 1>}, {pipeline_mode = #tpu.pipeline_mode<synchronous>, transform_indices = @transform_5, window_bounds = array<i64: 8, 32>}, {pipeline_mode = #tpu.pipeline_mode<synchronous>, transform_indices = @transform_6, window_bounds = array<i64: 32, 8>}, {transform_indices = @transform_7, window_bounds = array<i64: 32, 128>}]} {
    %c0 = arith.constant 0 : index
    %c0_0 = arith.constant 0 : index
    %0 = vector.load %arg3[%c0, %c0_0] : memref<32x32xbf16, #tpu.memory_space<vmem>>, vector<32x32xbf16>
    %c0_1 = arith.constant 0 : index
    %c0_2 = arith.constant 0 : index
    %1 = vector.load %arg2[%c0_1, %c0_2] : memref<32x128xbf16, #tpu.memory_space<vmem>>, vector<32x128xbf16>
    %cst = arith.constant dense<0.000000e+00> : vector<32x128xf32>
    %2 = tpu.matmul %0, %1, %cst {dimension_numbers = #tpu.dot_dimension_numbers<[1], [0], [0], [1], [0, 0, 1, 1], [], []>} : vector<32x32xbf16>, vector<32x128xbf16>, vector<32x128xf32> -> vector<32x128xf32>
    %c0_3 = arith.constant 0 : index
    %c0_4 = arith.constant 0 : index
    %3 = vector.load %arg4[%c0_3, %c0_4] : memref<32x1xf32, #tpu.memory_space<vmem>>, vector<32x1xf32>
    %4 = vector.broadcast %3 : vector<32x1xf32> to vector<32x128xf32>
    %5 = arith.addf %2, %4 : vector<32x128xf32>
    %c0_i32 = arith.constant 0 : i32
    %6 = arith.cmpi eq, %arg0, %c0_i32 : i32
    %c0_i32_5 = arith.constant 0 : i32
    %7 = arith.cmpi eq, %arg1, %c0_i32_5 : i32
    %8 = arith.andi %6, %7 : i1
    %9 = arith.extui %8 : i1 to i32
    %c0_i32_6 = arith.constant 0 : i32
    %10 = arith.cmpi ne, %9, %c0_i32_6 : i32
    scf.if %10 {
      %cst_13 = arith.constant 0.000000e+00 : f32
      %22 = vector.broadcast %cst_13 : f32 to vector<32x1xf32>
      %c0_14 = arith.constant 0 : index
      %c0_15 = arith.constant 0 : index
      %23 = vector.load %arg10[%c0_14, %c0_15] : memref<32x1xf32, #tpu.memory_space<vmem>>, vector<32x1xf32>
      tpu.vector_store %arg10[%c0_14, %c0_15], %22 {strides = array<i32>} : memref<32x1xf32, #tpu.memory_space<vmem>>, vector<32x1xf32>,
      %cst_16 = arith.constant 0.000000e+00 : f32
      %24 = vector.broadcast %cst_16 : f32 to vector<32x1xf32>
      %c0_17 = arith.constant 0 : index
      %c0_18 = arith.constant 0 : index
      %25 = vector.load %arg11[%c0_17, %c0_18] : memref<32x1xf32, #tpu.memory_space<vmem>>, vector<32x1xf32>
      tpu.vector_store %arg11[%c0_17, %c0_18], %24 {strides = array<i32>} : memref<32x1xf32, #tpu.memory_space<vmem>>, vector<32x1xf32>,
    } else {
    }
    %c0_i32_7 = arith.constant 0 : i32
    %11 = arith.cmpi eq, %arg0, %c0_i32_7 : i32
    %12 = arith.extui %11 : i1 to i32
    %c0_i32_8 = arith.constant 0 : i32
    %13 = arith.cmpi ne, %12, %c0_i32_8 : i32
    scf.if %13 {
      %22 = tpu.iota {dimensions = array<i32: 1>} : vector<32x128xi32>
      %c128_i32 = arith.constant 128 : i32
      %23 = arith.muli %arg1, %c128_i32 : i32
      %24 = vector.broadcast %23 : i32 to vector<32x128xi32>
      %25 = arith.addi %22, %24 : vector<32x128xi32>
      %c32_i32 = arith.constant 32 : i32
      %26 = vector.broadcast %c32_i32 : i32 to vector<32x128xi32>
      %27 = arith.cmpi slt, %25, %26 : vector<32x128xi32>
      %cst_13 = arith.constant 0.000000e+00 : f32
      %28 = vector.broadcast %cst_13 : f32 to vector<32x128xf32>
      %29 = arith.select %27, %5, %28 : vector<32x128xi1>, vector<32x128xf32>
      %c0_14 = arith.constant 0 : index
      %c0_15 = arith.constant 0 : index
      %30 = vector.load %arg10[%c0_14, %c0_15] : memref<32x1xf32, #tpu.memory_space<vmem>>, vector<32x1xf32>
      %cst_16 = arith.constant dense<0.000000e+00> : vector<32xf32>
      %31 = vector.multi_reduction <add>, %29, %cst_16 [1] : vector<32x128xf32> to vector<32xf32>
      %32 = vector.shape_cast %31 : vector<32xf32> to vector<32x1xf32>
      %33 = arith.addf %30, %32 : vector<32x1xf32>
      %c0_17 = arith.constant 0 : index
      %c0_18 = arith.constant 0 : index
      %34 = vector.load %arg10[%c0_17, %c0_18] : memref<32x1xf32, #tpu.memory_space<vmem>>, vector<32x1xf32>
      tpu.vector_store %arg10[%c0_17, %c0_18], %33 {strides = array<i32>} : memref<32x1xf32, #tpu.memory_space<vmem>>, vector<32x1xf32>,
      %c0_19 = arith.constant 0 : index
      %c0_20 = arith.constant 0 : index
      %35 = vector.load %arg11[%c0_19, %c0_20] : memref<32x1xf32, #tpu.memory_space<vmem>>, vector<32x1xf32>
      %36 = arith.mulf %29, %29 : vector<32x128xf32>
      %cst_21 = arith.constant dense<0.000000e+00> : vector<32xf32>
      %37 = vector.multi_reduction <add>, %36, %cst_21 [1] : vector<32x128xf32> to vector<32xf32>
      %38 = vector.shape_cast %37 : vector<32xf32> to vector<32x1xf32>
      %39 = arith.addf %35, %38 : vector<32x1xf32>
      %c0_22 = arith.constant 0 : index
      %c0_23 = arith.constant 0 : index
      %40 = vector.load %arg11[%c0_22, %c0_23] : memref<32x1xf32, #tpu.memory_space<vmem>>, vector<32x1xf32>
      tpu.vector_store %arg11[%c0_22, %c0_23], %39 {strides = array<i32>} : memref<32x1xf32, #tpu.memory_space<vmem>>, vector<32x1xf32>,
    } else {
    }
    %c1_i32 = arith.constant 1 : i32
    %14 = arith.cmpi eq, %arg0, %c1_i32 : i32
    %c0_i32_9 = arith.constant 0 : i32
    %15 = arith.cmpi eq, %arg1, %c0_i32_9 : i32
    %16 = arith.andi %14, %15 : i1
    %17 = arith.extui %16 : i1 to i32
    %c0_i32_10 = arith.constant 0 : i32
    %18 = arith.cmpi ne, %17, %c0_i32_10 : i32
    scf.if %18 {
      %c0_13 = arith.constant 0 : index
      %c0_14 = arith.constant 0 : index
      %22 = vector.load %arg7[%c0_13, %c0_14] : memref<8x32xf32, #tpu.memory_space<vmem>>, vector<8x32xf32>
      %c0_15 = arith.constant 0 : index
      %c0_16 = arith.constant 0 : index
      %23 = vector.load %arg10[%c0_15, %c0_16] : memref<32x1xf32, #tpu.memory_space<vmem>>, vector<32x1xf32>
      %cst_17 = arith.constant dense<0.000000e+00> : vector<8x1xf32>
      %24 = tpu.matmul %22, %23, %cst_17 {dimension_numbers = #tpu.dot_dimension_numbers<[1], [0], [0], [1], [0, 0, 1, 1], [], []>} : vector<8x32xf32>, vector<32x1xf32>, vector<8x1xf32> -> vector<8x1xf32>
      %c0_18 = arith.constant 0 : index
      %c0_19 = arith.constant 0 : index
      %25 = vector.load %arg7[%c0_18, %c0_19] : memref<8x32xf32, #tpu.memory_space<vmem>>, vector<8x32xf32>
      %c0_20 = arith.constant 0 : index
      %c0_21 = arith.constant 0 : index
      %26 = vector.load %arg11[%c0_20, %c0_21] : memref<32x1xf32, #tpu.memory_space<vmem>>, vector<32x1xf32>
      %cst_22 = arith.constant dense<0.000000e+00> : vector<8x1xf32>
      %27 = tpu.matmul %25, %26, %cst_22 {dimension_numbers = #tpu.dot_dimension_numbers<[1], [0], [0], [1], [0, 0, 1, 1], [], []>} : vector<8x32xf32>, vector<32x1xf32>, vector<8x1xf32> -> vector<8x1xf32>
      %cst_23 = arith.constant 1.280000e+02 : f32
      %28 = vector.broadcast %cst_23 : f32 to vector<8x1xf32>
      %29 = arith.divf %24, %28 : vector<8x1xf32>
      %cst_24 = arith.constant 1.280000e+02 : f32
      %30 = vector.broadcast %cst_24 : f32 to vector<8x1xf32>
      %31 = arith.divf %27, %30 : vector<8x1xf32>
      %32 = arith.mulf %29, %29 : vector<8x1xf32>
      %33 = arith.subf %31, %32 : vector<8x1xf32>
      %cst_25 = arith.constant 0.000000e+00 : f32
      %34 = vector.broadcast %cst_25 : f32 to vector<8x1xf32>
      %35 = arith.maximumf %33, %34 : vector<8x1xf32>
      %cst_26 = arith.constant 9.99999974E-6 : f32
      %36 = vector.broadcast %cst_26 : f32 to vector<8x1xf32>
      %37 = arith.addf %35, %36 : vector<8x1xf32>
      %38 = math.rsqrt %37 : vector<8x1xf32>
      %c0_27 = arith.constant 0 : index
      %c0_28 = arith.constant 0 : index
      %39 = vector.load %arg5[%c0_27, %c0_28] : memref<8x1xf32, #tpu.memory_space<vmem>>, vector<8x1xf32>
      %40 = arith.mulf %39, %38 : vector<8x1xf32>
      %c0_29 = arith.constant 0 : index
      %c0_30 = arith.constant 0 : index
      %41 = vector.load %arg6[%c0_29, %c0_30] : memref<8x1xf32, #tpu.memory_space<vmem>>, vector<8x1xf32>
      %42 = arith.mulf %29, %40 : vector<8x1xf32>
      %43 = arith.subf %41, %42 : vector<8x1xf32>
      %c0_31 = arith.constant 0 : index
      %c0_32 = arith.constant 0 : index
      %44 = vector.load %arg8[%c0_31, %c0_32] : memref<32x8xf32, #tpu.memory_space<vmem>>, vector<32x8xf32>
      %cst_33 = arith.constant dense<0.000000e+00> : vector<32x1xf32>
      %45 = tpu.matmul %44, %40, %cst_33 {dimension_numbers = #tpu.dot_dimension_numbers<[1], [0], [0], [1], [0, 0, 1, 1], [], []>} : vector<32x8xf32>, vector<8x1xf32>, vector<32x1xf32> -> vector<32x1xf32>
      %c0_34 = arith.constant 0 : index
      %c0_35 = arith.constant 0 : index
      %46 = vector.load %arg12[%c0_34, %c0_35] : memref<32x1xf32, #tpu.memory_space<vmem>>, vector<32x1xf32>
      tpu.vector_store %arg12[%c0_34, %c0_35], %45 {strides = array<i32>} : memref<32x1xf32, #tpu.memory_space<vmem>>, vector<32x1xf32>,
      %c0_36 = arith.constant 0 : index
      %c0_37 = arith.constant 0 : index
      %47 = vector.load %arg8[%c0_36, %c0_37] : memref<32x8xf32, #tpu.memory_space<vmem>>, vector<32x8xf32>
      %cst_38 = arith.constant dense<0.000000e+00> : vector<32x1xf32>
      %48 = tpu.matmul %47, %43, %cst_38 {dimension_numbers = #tpu.dot_dimension_numbers<[1], [0], [0], [1], [0, 0, 1, 1], [], []>} : vector<32x8xf32>, vector<8x1xf32>, vector<32x1xf32> -> vector<32x1xf32>
      %c0_39 = arith.constant 0 : index
      %c0_40 = arith.constant 0 : index
      %49 = vector.load %arg13[%c0_39, %c0_40] : memref<32x1xf32, #tpu.memory_space<vmem>>, vector<32x1xf32>
      tpu.vector_store %arg13[%c0_39, %c0_40], %48 {strides = array<i32>} : memref<32x1xf32, #tpu.memory_space<vmem>>, vector<32x1xf32>,
    } else {
    }
    %c1_i32_11 = arith.constant 1 : i32
    %19 = arith.cmpi eq, %arg0, %c1_i32_11 : i32
    %20 = arith.extui %19 : i1 to i32
    %c0_i32_12 = arith.constant 0 : i32
    %21 = arith.cmpi ne, %20, %c0_i32_12 : i32
    scf.if %21 {
      %c0_13 = arith.constant 0 : index
      %c0_14 = arith.constant 0 : index
      %22 = vector.load %arg12[%c0_13, %c0_14] : memref<32x1xf32, #tpu.memory_space<vmem>>, vector<32x1xf32>
      %23 = vector.broadcast %22 : vector<32x1xf32> to vector<32x128xf32>
      %24 = arith.mulf %5, %23 : vector<32x128xf32>
      %c0_15 = arith.constant 0 : index
      %c0_16 = arith.constant 0 : index
      %25 = vector.load %arg13[%c0_15, %c0_16] : memref<32x1xf32, #tpu.memory_space<vmem>>, vector<32x1xf32>
      %26 = vector.broadcast %25 : vector<32x1xf32> to vector<32x128xf32>
      %27 = arith.addf %24, %26 : vector<32x128xf32>
      %cst_17 = arith.constant 0.000000e+00 : f32
      %28 = vector.broadcast %cst_17 : f32 to vector<32x128xf32>
      %29 = arith.maximumf %27, %28 : vector<32x128xf32>
      %30 = arith.truncf %29 : vector<32x128xf32> to vector<32x128xbf16>
      %c0_18 = arith.constant 0 : index
      %c0_19 = arith.constant 0 : index
      %31 = vector.load %arg9[%c0_18, %c0_19] : memref<32x128xbf16, #tpu.memory_space<vmem>>, vector<32x128xbf16>
      tpu.vector_store %arg9[%c0_18, %c0_19], %30 {strides = array<i32>} : memref<32x128xbf16, #tpu.memory_space<vmem>>, vector<32x128xbf16>,
    } else {
    }
    return
  }
  func.func @transform_0(%arg0: i32, %arg1: i32) -> (i32, i32) {
    %c0_i32 = arith.constant 0 : i32
    %c0_i32_0 = arith.constant 0 : i32
    return %c0_i32, %arg1 : i32, i32
  }
  func.func @transform_1(%arg0: i32, %arg1: i32) -> (i32, i32) {
    %c0_i32 = arith.constant 0 : i32
    %c0_i32_0 = arith.constant 0 : i32
    %c0_i32_1 = arith.constant 0 : i32
    return %c0_i32, %c0_i32_0 : i32, i32
  }
  func.func @transform_2(%arg0: i32, %arg1: i32) -> (i32, i32) {
    %c0_i32 = arith.constant 0 : i32
    %c0_i32_0 = arith.constant 0 : i32
    %c0_i32_1 = arith.constant 0 : i32
    return %c0_i32, %c0_i32_0 : i32, i32
  }
  func.func @transform_3(%arg0: i32, %arg1: i32) -> (i32, i32) {
    %c0_i32 = arith.constant 0 : i32
    %c0_i32_0 = arith.constant 0 : i32
    %c0_i32_1 = arith.constant 0 : i32
    return %c0_i32, %c0_i32_0 : i32, i32
  }
  func.func @transform_4(%arg0: i32, %arg1: i32) -> (i32, i32) {
    %c0_i32 = arith.constant 0 : i32
    %c0_i32_0 = arith.constant 0 : i32
    %c0_i32_1 = arith.constant 0 : i32
    return %c0_i32, %c0_i32_0 : i32, i32
  }
  func.func @transform_5(%arg0: i32, %arg1: i32) -> (i32, i32) {
    %c0_i32 = arith.constant 0 : i32
    %c0_i32_0 = arith.constant 0 : i32
    %c0_i32_1 = arith.constant 0 : i32
    return %c0_i32, %c0_i32_0 : i32, i32
  }
  func.func @transform_6(%arg0: i32, %arg1: i32) -> (i32, i32) {
    %c0_i32 = arith.constant 0 : i32
    %c0_i32_0 = arith.constant 0 : i32
    %c0_i32_1 = arith.constant 0 : i32
    return %c0_i32, %c0_i32_0 : i32, i32
  }
  func.func @transform_7(%arg0: i32, %arg1: i32) -> (i32, i32) {
    %0 = arith.muli %arg0, %arg1 : i32
    %c0_i32 = arith.constant 0 : i32
    %c0_i32_0 = arith.constant 0 : i32
    return %c0_i32, %0 : i32, i32
  }
}

module attributes {stable_mosaic.version = 11 : i64} {
  func.func @_convt_bn_act_kernel(%arg0: i32, %arg1: i32, %arg2: memref<32x128xbf16, #tpu.memory_space<vmem>>, %arg3: memref<16x32xbf16, #tpu.memory_space<vmem>>, %arg4: memref<16x1xf32, #tpu.memory_space<vmem>>, %arg5: memref<8x1xf32, #tpu.memory_space<vmem>>, %arg6: memref<8x1xf32, #tpu.memory_space<vmem>>, %arg7: memref<8x16xf32, #tpu.memory_space<vmem>>, %arg8: memref<16x8xf32, #tpu.memory_space<vmem>>, %arg9: memref<16x128xf32, #tpu.memory_space<vmem>>, %arg10: memref<16x1xf32, #tpu.memory_space<vmem>>, %arg11: memref<16x1xf32, #tpu.memory_space<vmem>>, %arg12: memref<16x1xf32, #tpu.memory_space<vmem>>, %arg13: memref<16x1xf32, #tpu.memory_space<vmem>>) attributes {dimension_semantics = [#tpu.dimension_semantics<arbitrary>, #tpu.dimension_semantics<arbitrary>], iteration_bounds = array<i64: 2, 1>, scalar_prefetch = 0 : i64, scratch_operands = 4 : i64, tpu.core_type = #tpu.core_type<tc>, window_params = [{transform_indices = @transform_0, window_bounds = array<i64: 32, 128>}, {pipeline_mode = #tpu.pipeline_mode<synchronous>, transform_indices = @transform_1, window_bounds = array<i64: 16, 32>}, {pipeline_mode = #tpu.pipeline_mode<synchronous>, transform_indices = @transform_2, window_bounds = array<i64: 16, 1>}, {pipeline_mode = #tpu.pipeline_mode<synchronous>, transform_indices = @transform_3, window_bounds = array<i64: 8, 1>}, {pipeline_mode = #tpu.pipeline_mode<synchronous>, transform_indices = @transform_4, window_bounds = array<i64: 8, 1>}, {pipeline_mode = #tpu.pipeline_mode<synchronous>, transform_indices = @transform_5, window_bounds = array<i64: 8, 16>}, {pipeline_mode = #tpu.pipeline_mode<synchronous>, transform_indices = @transform_6, window_bounds = array<i64: 16, 8>}, {transform_indices = @transform_7, window_bounds = array<i64: 16, 128>}]} {
    %c0 = arith.constant 0 : index
    %c0_0 = arith.constant 0 : index
    %0 = vector.load %arg3[%c0, %c0_0] : memref<16x32xbf16, #tpu.memory_space<vmem>>, vector<16x32xbf16>
    %c0_1 = arith.constant 0 : index
    %c0_2 = arith.constant 0 : index
    %1 = vector.load %arg2[%c0_1, %c0_2] : memref<32x128xbf16, #tpu.memory_space<vmem>>, vector<32x128xbf16>
    %cst = arith.constant dense<0.000000e+00> : vector<16x128xf32>
    %2 = tpu.matmul %0, %1, %cst {dimension_numbers = #tpu.dot_dimension_numbers<[1], [0], [0], [1], [0, 0, 1, 1], [], []>} : vector<16x32xbf16>, vector<32x128xbf16>, vector<16x128xf32> -> vector<16x128xf32>
    %c0_3 = arith.constant 0 : index
    %c0_4 = arith.constant 0 : index
    %3 = vector.load %arg4[%c0_3, %c0_4] : memref<16x1xf32, #tpu.memory_space<vmem>>, vector<16x1xf32>
    %4 = vector.broadcast %3 : vector<16x1xf32> to vector<16x128xf32>
    %5 = arith.addf %2, %4 : vector<16x128xf32>
    %c0_i32 = arith.constant 0 : i32
    %6 = arith.cmpi eq, %arg0, %c0_i32 : i32
    %c0_i32_5 = arith.constant 0 : i32
    %7 = arith.cmpi eq, %arg1, %c0_i32_5 : i32
    %8 = arith.andi %6, %7 : i1
    %9 = arith.extui %8 : i1 to i32
    %c0_i32_6 = arith.constant 0 : i32
    %10 = arith.cmpi ne, %9, %c0_i32_6 : i32
    scf.if %10 {
      %cst_13 = arith.constant 0.000000e+00 : f32
      %22 = vector.broadcast %cst_13 : f32 to vector<16x1xf32>
      %c0_14 = arith.constant 0 : index
      %c0_15 = arith.constant 0 : index
      %23 = vector.load %arg10[%c0_14, %c0_15] : memref<16x1xf32, #tpu.memory_space<vmem>>, vector<16x1xf32>
      tpu.vector_store %arg10[%c0_14, %c0_15], %22 {strides = array<i32>} : memref<16x1xf32, #tpu.memory_space<vmem>>, vector<16x1xf32>,
      %cst_16 = arith.constant 0.000000e+00 : f32
      %24 = vector.broadcast %cst_16 : f32 to vector<16x1xf32>
      %c0_17 = arith.constant 0 : index
      %c0_18 = arith.constant 0 : index
      %25 = vector.load %arg11[%c0_17, %c0_18] : memref<16x1xf32, #tpu.memory_space<vmem>>, vector<16x1xf32>
      tpu.vector_store %arg11[%c0_17, %c0_18], %24 {strides = array<i32>} : memref<16x1xf32, #tpu.memory_space<vmem>>, vector<16x1xf32>,
    } else {
    }
    %c0_i32_7 = arith.constant 0 : i32
    %11 = arith.cmpi eq, %arg0, %c0_i32_7 : i32
    %12 = arith.extui %11 : i1 to i32
    %c0_i32_8 = arith.constant 0 : i32
    %13 = arith.cmpi ne, %12, %c0_i32_8 : i32
    scf.if %13 {
      %22 = tpu.iota {dimensions = array<i32: 1>} : vector<16x128xi32>
      %c128_i32 = arith.constant 128 : i32
      %23 = arith.muli %arg1, %c128_i32 : i32
      %24 = vector.broadcast %23 : i32 to vector<16x128xi32>
      %25 = arith.addi %22, %24 : vector<16x128xi32>
      %c128_i32_13 = arith.constant 128 : i32
      %26 = vector.broadcast %c128_i32_13 : i32 to vector<16x128xi32>
      %27 = arith.cmpi slt, %25, %26 : vector<16x128xi32>
      %cst_14 = arith.constant 0.000000e+00 : f32
      %28 = vector.broadcast %cst_14 : f32 to vector<16x128xf32>
      %29 = arith.select %27, %5, %28 : vector<16x128xi1>, vector<16x128xf32>
      %c0_15 = arith.constant 0 : index
      %c0_16 = arith.constant 0 : index
      %30 = vector.load %arg10[%c0_15, %c0_16] : memref<16x1xf32, #tpu.memory_space<vmem>>, vector<16x1xf32>
      %cst_17 = arith.constant dense<0.000000e+00> : vector<16xf32>
      %31 = vector.multi_reduction <add>, %29, %cst_17 [1] : vector<16x128xf32> to vector<16xf32>
      %32 = vector.shape_cast %31 : vector<16xf32> to vector<16x1xf32>
      %33 = arith.addf %30, %32 : vector<16x1xf32>
      %c0_18 = arith.constant 0 : index
      %c0_19 = arith.constant 0 : index
      %34 = vector.load %arg10[%c0_18, %c0_19] : memref<16x1xf32, #tpu.memory_space<vmem>>, vector<16x1xf32>
      tpu.vector_store %arg10[%c0_18, %c0_19], %33 {strides = array<i32>} : memref<16x1xf32, #tpu.memory_space<vmem>>, vector<16x1xf32>,
      %c0_20 = arith.constant 0 : index
      %c0_21 = arith.constant 0 : index
      %35 = vector.load %arg11[%c0_20, %c0_21] : memref<16x1xf32, #tpu.memory_space<vmem>>, vector<16x1xf32>
      %36 = arith.mulf %29, %29 : vector<16x128xf32>
      %cst_22 = arith.constant dense<0.000000e+00> : vector<16xf32>
      %37 = vector.multi_reduction <add>, %36, %cst_22 [1] : vector<16x128xf32> to vector<16xf32>
      %38 = vector.shape_cast %37 : vector<16xf32> to vector<16x1xf32>
      %39 = arith.addf %35, %38 : vector<16x1xf32>
      %c0_23 = arith.constant 0 : index
      %c0_24 = arith.constant 0 : index
      %40 = vector.load %arg11[%c0_23, %c0_24] : memref<16x1xf32, #tpu.memory_space<vmem>>, vector<16x1xf32>
      tpu.vector_store %arg11[%c0_23, %c0_24], %39 {strides = array<i32>} : memref<16x1xf32, #tpu.memory_space<vmem>>, vector<16x1xf32>,
    } else {
    }
    %c1_i32 = arith.constant 1 : i32
    %14 = arith.cmpi eq, %arg0, %c1_i32 : i32
    %c0_i32_9 = arith.constant 0 : i32
    %15 = arith.cmpi eq, %arg1, %c0_i32_9 : i32
    %16 = arith.andi %14, %15 : i1
    %17 = arith.extui %16 : i1 to i32
    %c0_i32_10 = arith.constant 0 : i32
    %18 = arith.cmpi ne, %17, %c0_i32_10 : i32
    scf.if %18 {
      %c0_13 = arith.constant 0 : index
      %c0_14 = arith.constant 0 : index
      %22 = vector.load %arg7[%c0_13, %c0_14] : memref<8x16xf32, #tpu.memory_space<vmem>>, vector<8x16xf32>
      %c0_15 = arith.constant 0 : index
      %c0_16 = arith.constant 0 : index
      %23 = vector.load %arg10[%c0_15, %c0_16] : memref<16x1xf32, #tpu.memory_space<vmem>>, vector<16x1xf32>
      %cst_17 = arith.constant dense<0.000000e+00> : vector<8x1xf32>
      %24 = tpu.matmul %22, %23, %cst_17 {dimension_numbers = #tpu.dot_dimension_numbers<[1], [0], [0], [1], [0, 0, 1, 1], [], []>} : vector<8x16xf32>, vector<16x1xf32>, vector<8x1xf32> -> vector<8x1xf32>
      %c0_18 = arith.constant 0 : index
      %c0_19 = arith.constant 0 : index
      %25 = vector.load %arg7[%c0_18, %c0_19] : memref<8x16xf32, #tpu.memory_space<vmem>>, vector<8x16xf32>
      %c0_20 = arith.constant 0 : index
      %c0_21 = arith.constant 0 : index
      %26 = vector.load %arg11[%c0_20, %c0_21] : memref<16x1xf32, #tpu.memory_space<vmem>>, vector<16x1xf32>
      %cst_22 = arith.constant dense<0.000000e+00> : vector<8x1xf32>
      %27 = tpu.matmul %25, %26, %cst_22 {dimension_numbers = #tpu.dot_dimension_numbers<[1], [0], [0], [1], [0, 0, 1, 1], [], []>} : vector<8x16xf32>, vector<16x1xf32>, vector<8x1xf32> -> vector<8x1xf32>
      %cst_23 = arith.constant 5.120000e+02 : f32
      %28 = vector.broadcast %cst_23 : f32 to vector<8x1xf32>
      %29 = arith.divf %24, %28 : vector<8x1xf32>
      %cst_24 = arith.constant 5.120000e+02 : f32
      %30 = vector.broadcast %cst_24 : f32 to vector<8x1xf32>
      %31 = arith.divf %27, %30 : vector<8x1xf32>
      %32 = arith.mulf %29, %29 : vector<8x1xf32>
      %33 = arith.subf %31, %32 : vector<8x1xf32>
      %cst_25 = arith.constant 0.000000e+00 : f32
      %34 = vector.broadcast %cst_25 : f32 to vector<8x1xf32>
      %35 = arith.maximumf %33, %34 : vector<8x1xf32>
      %cst_26 = arith.constant 9.99999974E-6 : f32
      %36 = vector.broadcast %cst_26 : f32 to vector<8x1xf32>
      %37 = arith.addf %35, %36 : vector<8x1xf32>
      %38 = math.rsqrt %37 : vector<8x1xf32>
      %c0_27 = arith.constant 0 : index
      %c0_28 = arith.constant 0 : index
      %39 = vector.load %arg5[%c0_27, %c0_28] : memref<8x1xf32, #tpu.memory_space<vmem>>, vector<8x1xf32>
      %40 = arith.mulf %39, %38 : vector<8x1xf32>
      %c0_29 = arith.constant 0 : index
      %c0_30 = arith.constant 0 : index
      %41 = vector.load %arg6[%c0_29, %c0_30] : memref<8x1xf32, #tpu.memory_space<vmem>>, vector<8x1xf32>
      %42 = arith.mulf %29, %40 : vector<8x1xf32>
      %43 = arith.subf %41, %42 : vector<8x1xf32>
      %c0_31 = arith.constant 0 : index
      %c0_32 = arith.constant 0 : index
      %44 = vector.load %arg8[%c0_31, %c0_32] : memref<16x8xf32, #tpu.memory_space<vmem>>, vector<16x8xf32>
      %cst_33 = arith.constant dense<0.000000e+00> : vector<16x1xf32>
      %45 = tpu.matmul %44, %40, %cst_33 {dimension_numbers = #tpu.dot_dimension_numbers<[1], [0], [0], [1], [0, 0, 1, 1], [], []>} : vector<16x8xf32>, vector<8x1xf32>, vector<16x1xf32> -> vector<16x1xf32>
      %c0_34 = arith.constant 0 : index
      %c0_35 = arith.constant 0 : index
      %46 = vector.load %arg12[%c0_34, %c0_35] : memref<16x1xf32, #tpu.memory_space<vmem>>, vector<16x1xf32>
      tpu.vector_store %arg12[%c0_34, %c0_35], %45 {strides = array<i32>} : memref<16x1xf32, #tpu.memory_space<vmem>>, vector<16x1xf32>,
      %c0_36 = arith.constant 0 : index
      %c0_37 = arith.constant 0 : index
      %47 = vector.load %arg8[%c0_36, %c0_37] : memref<16x8xf32, #tpu.memory_space<vmem>>, vector<16x8xf32>
      %cst_38 = arith.constant dense<0.000000e+00> : vector<16x1xf32>
      %48 = tpu.matmul %47, %43, %cst_38 {dimension_numbers = #tpu.dot_dimension_numbers<[1], [0], [0], [1], [0, 0, 1, 1], [], []>} : vector<16x8xf32>, vector<8x1xf32>, vector<16x1xf32> -> vector<16x1xf32>
      %c0_39 = arith.constant 0 : index
      %c0_40 = arith.constant 0 : index
      %49 = vector.load %arg13[%c0_39, %c0_40] : memref<16x1xf32, #tpu.memory_space<vmem>>, vector<16x1xf32>
      tpu.vector_store %arg13[%c0_39, %c0_40], %48 {strides = array<i32>} : memref<16x1xf32, #tpu.memory_space<vmem>>, vector<16x1xf32>,
    } else {
    }
    %c1_i32_11 = arith.constant 1 : i32
    %19 = arith.cmpi eq, %arg0, %c1_i32_11 : i32
    %20 = arith.extui %19 : i1 to i32
    %c0_i32_12 = arith.constant 0 : i32
    %21 = arith.cmpi ne, %20, %c0_i32_12 : i32
    scf.if %21 {
      %c0_13 = arith.constant 0 : index
      %c0_14 = arith.constant 0 : index
      %22 = vector.load %arg12[%c0_13, %c0_14] : memref<16x1xf32, #tpu.memory_space<vmem>>, vector<16x1xf32>
      %23 = vector.broadcast %22 : vector<16x1xf32> to vector<16x128xf32>
      %24 = arith.mulf %5, %23 : vector<16x128xf32>
      %c0_15 = arith.constant 0 : index
      %c0_16 = arith.constant 0 : index
      %25 = vector.load %arg13[%c0_15, %c0_16] : memref<16x1xf32, #tpu.memory_space<vmem>>, vector<16x1xf32>
      %26 = vector.broadcast %25 : vector<16x1xf32> to vector<16x128xf32>
      %27 = arith.addf %24, %26 : vector<16x128xf32>
      %28 = arith.negf %27 : vector<16x128xf32>
      %29 = math.exp %28 : vector<16x128xf32>
      %cst_17 = arith.constant 1.000000e+00 : f32
      %30 = vector.broadcast %cst_17 : f32 to vector<16x128xf32>
      %31 = arith.addf %30, %29 : vector<16x128xf32>
      %32 = arith.divf %30, %31 : vector<16x128xf32>
      %c0_18 = arith.constant 0 : index
      %c0_19 = arith.constant 0 : index
      %33 = vector.load %arg9[%c0_18, %c0_19] : memref<16x128xf32, #tpu.memory_space<vmem>>, vector<16x128xf32>
      tpu.vector_store %arg9[%c0_18, %c0_19], %32 {strides = array<i32>} : memref<16x128xf32, #tpu.memory_space<vmem>>, vector<16x128xf32>,
    } else {
    }
    return
  }
  func.func @transform_0(%arg0: i32, %arg1: i32) -> (i32, i32) {
    %c0_i32 = arith.constant 0 : i32
    %c0_i32_0 = arith.constant 0 : i32
    return %c0_i32, %arg1 : i32, i32
  }
  func.func @transform_1(%arg0: i32, %arg1: i32) -> (i32, i32) {
    %c0_i32 = arith.constant 0 : i32
    %c0_i32_0 = arith.constant 0 : i32
    %c0_i32_1 = arith.constant 0 : i32
    return %c0_i32, %c0_i32_0 : i32, i32
  }
  func.func @transform_2(%arg0: i32, %arg1: i32) -> (i32, i32) {
    %c0_i32 = arith.constant 0 : i32
    %c0_i32_0 = arith.constant 0 : i32
    %c0_i32_1 = arith.constant 0 : i32
    return %c0_i32, %c0_i32_0 : i32, i32
  }
  func.func @transform_3(%arg0: i32, %arg1: i32) -> (i32, i32) {
    %c0_i32 = arith.constant 0 : i32
    %c0_i32_0 = arith.constant 0 : i32
    %c0_i32_1 = arith.constant 0 : i32
    return %c0_i32, %c0_i32_0 : i32, i32
  }
  func.func @transform_4(%arg0: i32, %arg1: i32) -> (i32, i32) {
    %c0_i32 = arith.constant 0 : i32
    %c0_i32_0 = arith.constant 0 : i32
    %c0_i32_1 = arith.constant 0 : i32
    return %c0_i32, %c0_i32_0 : i32, i32
  }
  func.func @transform_5(%arg0: i32, %arg1: i32) -> (i32, i32) {
    %c0_i32 = arith.constant 0 : i32
    %c0_i32_0 = arith.constant 0 : i32
    %c0_i32_1 = arith.constant 0 : i32
    return %c0_i32, %c0_i32_0 : i32, i32
  }
  func.func @transform_6(%arg0: i32, %arg1: i32) -> (i32, i32) {
    %c0_i32 = arith.constant 0 : i32
    %c0_i32_0 = arith.constant 0 : i32
    %c0_i32_1 = arith.constant 0 : i32
    return %c0_i32, %c0_i32_0 : i32, i32
  }
  func.func @transform_7(%arg0: i32, %arg1: i32) -> (i32, i32) {
    %0 = arith.muli %arg0, %arg1 : i32
    %c0_i32 = arith.constant 0 : i32
    %c0_i32_0 = arith.constant 0 : i32
    return %c0_i32, %0 : i32, i32
  }
}

</mosaic_0001>

<bundles_post_ra>
// kernel: tile.10
= control target key start
LH: loop header
LB: loop body
LE: loop exit
PB: predicated region body
PF: predicated region fallthrough
CT: control target
= control target key end

     0   :  { %s22_s0 = inlined_call_operand.vmem [shape: f32[8], index: 0, kind: input, shape index: {}]   ;;  %s23_s1 = inlined_call_operand.vmem [shape: f32[4,1,1,8], index: 1, kind: output, shape index: {}]  }
   0x1   :  { %v4_v0 = vld [vmem:[%s22_s0] ss:$0 sm:$0xff] }
   0x2   :  { %5 = vst [vmem:[%s23_s1] sm:$0xf] %v4_v0 }

// kernel: tile.14
= control target key start
LH: loop header
LB: loop body
LE: loop exit
PB: predicated region body
PF: predicated region fallthrough
CT: control target
= control target key end

     0   :  { %s22_s0 = inlined_call_operand.vmem [shape: f32[4], index: 0, kind: input, shape index: {}]   ;;  %s23_s1 = inlined_call_operand.vmem [shape: f32[4,1,1,4], index: 1, kind: output, shape index: {}]  }
   0x1   :  { %v4_v0 = vld [vmem:[%s22_s0] ss:$0 sm:$0xff] }
   0x2   :  { %5 = vst [vmem:[%s23_s1] sm:$0xf] %v4_v0 }

// kernel: decoder_forward.3
= control target key start
LH: loop header
LB: loop body
LE: loop exit
PB: predicated region body
PF: predicated region fallthrough
CT: control target
= control target key end

     0   :  { %v118_v0 = vmov 0.0   ;;  %vm119_vm0 = vmmov 0   ;;  %vm24_vm1 = vcmask 130048   ;;  %s155_s1 = inlined_call_operand.vmem [shape: f32[16,128], index: 1, kind: input, shape index: {}]   ;;  %s156_s0 = inlined_call_operand.vmem [shape: f32[2,16], index: 0, kind: input, shape index: {}]   ;;  %s157_s2 = inlined_call_operand.vmem [shape: f32[1,128], index: 2, kind: input, shape index: {}]   ;;  %s158_s3 = inlined_call_operand.vmem [shape: f32[2,128], index: 3, kind: output, shape index: {}]  }
   0x1   :  { %109 = vmatprep.subr.mxu0 %v118_v0  ;;  %v16_v1 = vld [vmem:[%s155_s1 + $0x8] sm:$0xff]  ;;  %v15_v2 = vld [vmem:[%s155_s1] sm:$0xff]  ;;  %113 = vmatprep.mubr.msk.f32.mxu0 %vm119_vm0, %v118_v0 }
   0x2   :  { %110 = vmatpush3.msra.mxu0 %v16_v1  ;;  %v14_v3 = vld [vmem:[%s156_s0] sm:$0x3] }
   0x3   :  { %111 = vmatprep.subr.mxu0 %v118_v0  ;;  %v104_v4 = vld [vmem:[%s157_s2] ss:$0 sm:$0xff] }
   0x4   :  { %112 = vmatpush3.msra.mxu0 %v15_v2 }
   0x5   :  { %114 = vmatmul.mubr.msk.f32.vlgmr.msra.gmra.mxu0 %vm24_vm1, %v14_v3 }
  0xc5   :  { %v94_v5 = vpop.f32.mrf.mxu0 }
  0xc6   :  { %v95_v6 = vadd.f32 %v104_v4, %v94_v5 }
  0xc7   :  { %v115_v7 = vpop.f32.mrf.mxu0 }
  0xc8   :  { %v98_v8 = vmax.f32 %v95_v6, 0.0 }
  0xca   :  { %99 = vst [vmem:[%s158_s3] sm:$0x3] %v98_v8 }

// kernel: decoder_forward.4
= control target key start
LH: loop header
LB: loop body
LE: loop exit
PB: predicated region body
PF: predicated region fallthrough
CT: control target
= control target key end

     0   :  { %s1236_s24 = smov 0   ;;  %s1238_s25 = smov 0   ;;  %s1364_s0 = inlined_call_operand.vmem [shape: bf16[32,128], index: 0, kind: input, shape index: {}]   ;;  %s1365_s1 = inlined_call_operand.vmem [shape: bf16[32,32], index: 1, kind: input, shape index: {}]   ;;  %s1366_s2 = inlined_call_operand.vmem [shape: f32[32,1], index: 2, kind: input, shape index: {}]   ;;  %s1367_s3 = inlined_call_operand.vmem [shape: f32[8,1], index: 3, kind: input, shape index: {}]   ;;  %s1368_s4 = inlined_call_operand.vmem [shape: f32[8,1], index: 4, kind: input, shape index: {}]   ;;  %s1369_s5 = inlined_call_operand.vmem [shape: f32[8,32], index: 5, kind: input, shape index: {}]   ;;  %s1370_s6 = inlined_call_operand.vmem [shape: f32[32,8], index: 6, kind: input, shape index: {}]   ;;  %s1371_s7 = inlined_call_operand.vmem [shape: bf16[32,128], index: 7, kind: output, shape index: {}]  }
   0x1   :  { %s1240_s26 = smov 0  }
   0x2 LB: > { %s29_s27 = sadd.s32 1, %s1185_s25  ;;  %p1012_p0 = scmp.ge.s32.totalorder %s1189_s26, 1  ;;  %s1189_s26 = sphi %s1240_s26, %s17_s26   ;;  %s1185_s25 = sphi %s1238_s25, %s1373_s25   ;;  %s1181_s24 = sphi %s1236_s24, %s1372_s24  }
   0x3   : > { %p31_p1 = scmp.ge.s32.totalorder %s29_s27, 2  ;;  %p250_p2 = scmp.lt.s32.totalorder %s1189_s26, 3 }
   0x5   : > { %s1375_s27 = smov (%p31_p1, %s29_s27), 0  ;;  %p251_p3 = pnand %p1012_p0, %p250_p2 }
   0x6   : > { %p402_p4 = scmp.eq.s32.totalorder (!%p251_p3), %s1181_s24, 0 }
   0x7   : > { %254 = sbr.rel (%p251_p3) target bundleno = 976 (0x3d0), region = 48 }
   0xc   : > { %v1159_v0 = vld [vmem:[%s1364_s0 + $0x8] sm:$0xff]   ;;  %vm346_vm0 = vcmask 261120   ;;  %v1160_v1 = vld [vmem:[%s1364_s0] sm:$0xff]   ;;  %v1191_v3 = vmov 0   ;;  %v302_v4 = vld [vmem:[%s1366_s2 + $0x10] sm:$0xff]  ;;  %vm408_vm1 = vcmask (%p402_p4), 7168  }
   0xd   : > { %1082 = vmatprep.subr.bf16.mxu0 %v1159_v0  ;;  %v1161_v2 = vld [vmem:[%s1365_s1] sm:$0xff]   ;;  %1158 = vset.pattern.permute.xlu1 %v1191_v3  ;;  %v1162_v6 = vld [vmem:[%s1365_s1 + $0x8] sm:$0xff]   ;;  %v303_v7 = vld [vmem:[%s1366_s2 + $0x18] sm:$0xff]  ;;  %v1192_v21 = vmov (%p402_p4), 0.0  }
   0xe   : > { %1083 = vmatpush3.bf16.msra.mxu0 %v1159_v0  ;;  %1157 = vset.pattern.permute.xlu0 %v1191_v3  ;;  %v300_v5 = vld [vmem:[%s1366_s2] sm:$0xff]  ;;  %v301_v8 = vld [vmem:[%s1366_s2 + $0x8] sm:$0xff]  ;;  %409 = vst.msk [vmem:[#allocation2] sm:$0xff] (%p402_p4), %vm408_vm1, %v1192_v21  ;;  %410 = vst.msk [vmem:[#allocation2 + $0x8] sm:$0xff] (%p402_p4), %vm408_vm1, %v1192_v21 }
   0xf   : > { %1084 = vmatprep.subr.bf16.mxu0 %v1160_v1  ;;  %1086 = vmatprep.mubr.msk.bf16.mxu0 %vm346_vm0, %v1161_v2  ;;  %411 = vst.msk [vmem:[#allocation2 + $0x10] sm:$0xff] (%p402_p4), %vm408_vm1, %v1192_v21  ;;  %412 = vst.msk [vmem:[#allocation2 + $0x18] sm:$0xff] (%p402_p4), %vm408_vm1, %v1192_v21 }
  0x10   : > { %316 = vperm.xlu1 %1158, %v302_v4   ;;  %306 = vperm.xlu0 %1157, %v300_v5   ;;  %413 = vst.msk [vmem:[#allocation3] sm:$0xff] (%p402_p4), %vm408_vm1, %v1192_v21  ;;  %414 = vst.msk [vmem:[#allocation3 + $0x8] sm:$0xff] (%p402_p4), %vm408_vm1, %v1192_v21 }
  0x11   : > { %415 = vst.msk [vmem:[#allocation3 + $0x10] sm:$0xff] (%p402_p4), %vm408_vm1, %v1192_v21  ;;  %416 = vst.msk [vmem:[#allocation3 + $0x18] sm:$0xff] (%p402_p4), %vm408_vm1, %v1192_v21 }
  0x12   : > { %1085 = vmatpush3.bf16.msra.mxu0 %v1160_v1 }
  0x14   : > { %321 = vperm.xlu1 %1158, %v303_v7   ;;  %311 = vperm.xlu0 %1157, %v301_v8  }
  0x15   : > { %1087 = vmatmul.mubr.msk.bf16.vlgmr.msra.gmra.mxu0 %vm346_vm0, %v1162_v6 }
  0x8b   : > { %v317_v9 = vpop.permute.xlu1 %316  ;;  %v307_v10 = vpop.permute.xlu0 %306 }
  0x8f   : > { %v322_v15 = vpop.permute.xlu1 %321  ;;  %v312_v18 = vpop.permute.xlu0 %311 }
  0xd5   : > { %v1088_v11 = vpop.f32.mrf.mxu0 }
  0xd6   : > { %v1283_v12 = vadd.f32 %v1088_v11, %v317_v9 }
  0xd7   : > { %v387_v13 = vpop.f32.mrf.mxu0 }
  0xd8   : > { %v1285_v14 = vadd.f32 %v387_v13, %v307_v10  ;;  %407 = sbr.rel (!%p402_p4) target bundleno = 221 (0xdd), region = 52 }
  0xd9   : > { %v1089_v16 = vpop.f32.mrf.mxu0 }
  0xda   : > { %v1287_v17 = vadd.f32 %v1089_v16, %v322_v15 }
  0xdb   : > { %v390_v19 = vpop.f32.mrf.mxu0 }
  0xdc   : > { %v1289_v20 = vadd.f32 %v390_v19, %v312_v18 }
  0xdd PF: > { %p1020_p5 = scmp.ne.s32.totalorder %s1181_s24, 0 }
  0xdf   : > { %419 = sbr.rel (%p1020_p5) target bundleno = 387 (0x183), region = 56 }
  0xe4   : > { %v420_v22 = vlaneseq  ;;  %v432_v32 = vld [vmem:[#allocation2 + $0x10] sm:$0xff]  ;;  %v430_v33 = vld [vmem:[#allocation2] sm:$0xff]  ;;  %vm446_vm3 = vcmask 7168   ;;  %v433_v38 = vld [vmem:[#allocation2 + $0x18] sm:$0xff] }
  0xe5   : > { %v431_v39 = vld [vmem:[#allocation2 + $0x8] sm:$0xff]  ;;  %v451_v45 = vld [vmem:[#allocation3] sm:$0xff]  ;;  %v454_v50 = vld [vmem:[#allocation3 + $0x18] sm:$0xff] }
  0xe6   : > { %v421_v23 = vand.u32 127, %v420_v22  ;;  %v452_v44 = vld [vmem:[#allocation3 + $0x8] sm:$0xff]  ;;  %v453_v51 = vld [vmem:[#allocation3 + $0x10] sm:$0xff] }
  0xe8   : > { %vm425_vm2 = vcmp.lt.s32.totalorder %v421_v23, 32 }
  0xe9   : > { %v428_v24 = vsel %vm425_vm2, %v1283_v12, 0.0  ;;  %v426_v25 = vsel %vm425_vm2, %v1285_v14, 0.0  ;;  %v429_v26 = vsel %vm425_vm2, %v1287_v17, 0.0  ;;  %v427_v27 = vsel %vm425_vm2, %v1289_v20, 0.0 }
  0xea   : > { %438 = vadd.xlane.f32.xlu1 %v428_v24  ;;  %434 = vadd.xlane.f32.xlu0 %v426_v25  ;;  %v456_v28 = vmul.f32 %v427_v27, %v427_v27  ;;  %v455_v29 = vmul.f32 %v426_v25, %v426_v25  ;;  %v458_v30 = vmul.f32 %v429_v26, %v429_v26 }
  0xeb   : > { %v457_v31 = vmul.f32 %v428_v24, %v428_v24 }
  0xee   : > { %440 = vadd.xlane.f32.xlu1 %v429_v26  ;;  %436 = vadd.xlane.f32.xlu0 %v427_v27 }
  0xf2   : > { %461 = vadd.xlane.f32.xlu1 %v456_v28  ;;  %459 = vadd.xlane.f32.xlu0 %v455_v29 }
  0xf6   : > { %465 = vadd.xlane.f32.xlu1 %v458_v30  ;;  %463 = vadd.xlane.f32.xlu0 %v457_v31 }
 0x173   : > { %v439_v34 = vpop.xlane.xlu1 %438  ;;  %v435_v35 = vpop.xlane.xlu0 %434 }
 0x174   : > { %v444_v36 = vadd.f32 %v439_v34, %v432_v32  ;;  %v442_v37 = vadd.f32 %v435_v35, %v430_v33 }
 0x176   : > { %449 = vst.msk [vmem:[#allocation2 + $0x10] sm:$0xff] %vm446_vm3, %v444_v36  ;;  %447 = vst.msk [vmem:[#allocation2] sm:$0xff] %vm446_vm3, %v442_v37 }
 0x177   : > { %v441_v40 = vpop.xlane.xlu1 %440  ;;  %v437_v41 = vpop.xlane.xlu0 %436 }
 0x178   : > { %v445_v42 = vadd.f32 %v441_v40, %v433_v38  ;;  %v443_v43 = vadd.f32 %v437_v41, %v431_v39 }
 0x17a   : > { %450 = vst.msk [vmem:[#allocation2 + $0x18] sm:$0xff] %vm446_vm3, %v445_v42  ;;  %448 = vst.msk [vmem:[#allocation2 + $0x8] sm:$0xff] %vm446_vm3, %v443_v43 }
 0x17b   : > { %v462_v46 = vpop.xlane.xlu1 %461  ;;  %v460_v47 = vpop.xlane.xlu0 %459 }
 0x17c   : > { %v468_v48 = vadd.f32 %v462_v46, %v452_v44  ;;  %v467_v49 = vadd.f32 %v460_v47, %v451_v45 }
 0x17e   : > { %472 = vst.msk [vmem:[#allocation3 + $0x8] sm:$0xff] %vm446_vm3, %v468_v48  ;;  %471 = vst.msk [vmem:[#allocation3] sm:$0xff] %vm446_vm3, %v467_v49 }
 0x17f   : > { %v466_v52 = vpop.xlane.xlu1 %465  ;;  %v464_v53 = vpop.xlane.xlu0 %463 }
 0x180   : > { %v470_v54 = vadd.f32 %v466_v52, %v454_v50  ;;  %v469_v55 = vadd.f32 %v464_v53, %v453_v51 }
 0x182   : > { %474 = vst.msk [vmem:[#allocation3 + $0x18] sm:$0xff] %vm446_vm3, %v470_v54  ;;  %473 = vst.msk [vmem:[#allocation3 + $0x10] sm:$0xff] %vm446_vm3, %v469_v55 }
 0x183 PF: > { %p475_p6 = scmp.eq.s32.totalorder %s1181_s24, 1 }
 0x184   : > { %v484_v56 = vld [vmem:[#allocation2 + $0x18] sm:$0xff] (%p475_p6)  ;;  %v1193_v58 = vmov (%p475_p6), 0.0   ;;  %v483_v59 = vld [vmem:[#allocation2 + $0x10] sm:$0xff] (%p475_p6)  ;;  %v482_v61 = vld [vmem:[#allocation2 + $0x8] sm:$0xff] (%p475_p6)  ;;  %vm1194_vm4 = vmmov (%p475_p6), 0   ;;  %vm649_vm5 = vcmask (%p475_p6), 64512  }
 0x185   : > { %479 = sbr.rel (!%p475_p6) target bundleno = 824 (0x338), region = 60  ;;  %1090 = vmatprep.subr.mxu0 (%p475_p6), %v1193_v58  ;;  %1101 = vmatprep.subr.mxu1 (%p475_p6), %v1193_v58  ;;  %v559_v62 = vld [vmem:[#allocation3 + $0x8] sm:$0xff] (%p475_p6)  ;;  %v481_v63 = vld [vmem:[#allocation2] sm:$0xff] (%p475_p6)  ;;  %v647_v23 = vld [vmem:[%s1370_s6 + $0x10] sm:$0xff] (%p475_p6)  ;;  %vm747_vm6 = vcmask (%p475_p6), 7168  }
 0x186   : > { %1091 = vmatpush3.msra.mxu0 (%p475_p6), %v484_v56  ;;  %v558_v0 = vld [vmem:[#allocation3] sm:$0xff] (%p475_p6)  ;;  %1098 = vmatprep.mubr.msk.f32.mxu0 (%p475_p6), %vm1194_vm4, %v1193_v58  ;;  %v646_v21 = vld [vmem:[%s1370_s6 + $0x8] sm:$0xff] (%p475_p6)  ;;  %v648_v25 = vld [vmem:[%s1370_s6 + $0x18] sm:$0xff] (%p475_p6) }
 0x187   : > { %1092 = vmatprep.subr.mxu0 (%p475_p6), %v1193_v58  ;;  %v480_v1 = vld [vmem:[%s1369_s5] sm:$0xff] (%p475_p6)  ;;  %1109 = vmatprep.mubr.msk.f32.mxu1 (%p475_p6), %vm1194_vm4, %v1193_v58 }
 0x188   : > { %1093 = vmatpush3.msra.mxu0 (%p475_p6), %v483_v59  ;;  %v645_v2 = vld [vmem:[%s1370_s6] sm:$0xff] (%p475_p6) }
 0x189   : > { %v561_v57 = vld [vmem:[#allocation3 + $0x18] sm:$0xff] (%p475_p6)  ;;  %v560_v60 = vld [vmem:[#allocation3 + $0x10] sm:$0xff] (%p475_p6)  ;;  %1094 = vmatprep.subr.mxu0 (%p475_p6), %v1193_v58  ;;  %v640_v15 = vld [vmem:[%s1367_s3] sm:$0xff] (%p475_p6) }
 0x18a   : > { %1102 = vmatpush3.msra.mxu1 %v561_v57  ;;  %1095 = vmatpush3.msra.mxu0 %v482_v61  ;;  %v642_v19 = vld [vmem:[%s1368_s4] sm:$0xff] }
 0x18b   : > { %1103 = vmatprep.subr.mxu1 %v1193_v58  ;;  %1096 = vmatprep.subr.mxu0 %v1193_v58 }
 0x18c   : > { %1104 = vmatpush3.msra.mxu1 %v560_v60  ;;  %1097 = vmatpush3.msra.mxu0 %v481_v63 }
 0x18d   : > { %1105 = vmatprep.subr.mxu1 %v1193_v58  ;;  %1099 = vmatmul.mubr.msk.f32.vlgmr.msra.gmra.mxu0 %vm346_vm0, %v480_v1 }
 0x18e   : > { %1106 = vmatpush3.msra.mxu1 %v559_v62  ;;  %1114 = vmatprep.mubr.msk.f32.mxu0 %vm649_vm5, %v645_v2 }
 0x18f   : > { %1107 = vmatprep.subr.mxu1 %v1193_v58 }
 0x190   : > { %1108 = vmatpush3.msra.mxu1 %v558_v0 }
 0x191   : > { %1110 = vmatmul.mubr.msk.f32.vlgmr.msra.gmra.mxu1 %vm346_vm0, %v480_v1 }
 0x192   : > { %1122 = vmatprep.mubr.msk.f32.mxu1 %vm649_vm5, %v645_v2 }
 0x24d   : > { %v554_v3 = vpop.f32.mrf.mxu0 }
 0x24e   : > { %v633_v5 = vmul.f32 0.0078125, %v554_v3 }
 0x24f   : > { %v1100_v7 = vpop.f32.mrf.mxu0 }
 0x250   : > { %v635_v9 = vmul.f32 %v633_v5, %v633_v5 }
 0x251   : > { %v628_v4 = vpop.f32.mrf.mxu1 }
 0x252   : > { %v634_v6 = vmul.f32 0.0078125, %v628_v4 }
 0x253   : > { %v1111_v8 = vpop.f32.mrf.mxu1 }
 0x254   : > { %v636_v10 = vsub.f32 %v634_v6, %v635_v9 }
 0x256   : > { %v637_v11 = vmax.f32 %v636_v10, 0.0 }
 0x258   : > { %v638_v13 = vadd.f32 1e-05, %v637_v11 }
 0x25a   : > { %1163 = vrsqrt.f32 %v638_v13 }
 0x267   : > { %v1164_v16 = vpop.eup %1163 }
 0x268   : > { %v641_v18 = vmul.f32 %v1164_v16, %v640_v15 }
 0x26a   : > { %1112 = vmatprep.subr.mxu0 %v641_v18  ;;  %v643_v22 = vmul.f32 %v641_v18, %v633_v5 }
 0x26b   : > { %1113 = vmatpush3.msra.mxu0 %v641_v18 }
 0x26c   : > { %v644_v24 = vsub.f32 %v642_v19, %v643_v22  ;;  %1115 = vmatmul.mubr.msk.f32.vlgmr.msra.gmra.mxu0 %vm649_vm5, %v646_v21 }
 0x26d   : > { %1117 = vmatprep.mubr.msk.f32.mxu0 %vm649_vm5, %v647_v23 }
 0x26e   : > { %1120 = vmatprep.subr.mxu1 %v644_v24 }
 0x26f   : > { %1121 = vmatpush3.msra.mxu1 %v644_v24 }
 0x270   : > { %1123 = vmatmul.mubr.msk.f32.vlgmr.msra.gmra.mxu1 %vm649_vm5, %v646_v21  ;;  %1118 = vmatmul.mubr.msk.f32.gmra.mxu0 %vm649_vm5, %v648_v25 }
 0x271   : > { %1125 = vmatprep.mubr.msk.f32.mxu1 %vm649_vm5, %v647_v23 }
 0x274   : > { %1126 = vmatmul.mubr.msk.f32.gmra.mxu1 %vm649_vm5, %v648_v25 }
 0x32c   : > { %v1116_v26 = vpop.f32.mrf.mxu0 }
 0x32d   : > { %749 = vst.msk [vmem:[#allocation4 + $0x8] sm:$0xff] %vm747_vm6, %v1116_v26 }
 0x32e   : > { %v728_v27 = vpop.f32.mrf.mxu0 }
 0x32f   : > { %748 = vst.msk [vmem:[#allocation4] sm:$0xff] %vm747_vm6, %v728_v27 }
 0x330   : > { %v1124_v28 = vpop.f32.mrf.mxu1  ;;  %v1119_v29 = vpop.f32.mrf.mxu0 }
 0x331   : > { %854 = vst.msk [vmem:[#allocation5 + $0x8] sm:$0xff] %vm747_vm6, %v1124_v28  ;;  %751 = vst.msk [vmem:[#allocation4 + $0x18] sm:$0xff] %vm747_vm6, %v1119_v29 }
 0x332   : > { %v834_v30 = vpop.f32.mrf.mxu1  ;;  %v738_v31 = vpop.f32.mrf.mxu0 }
 0x333   : > { %853 = vst.msk [vmem:[#allocation5] sm:$0xff] %vm747_vm6, %v834_v30  ;;  %750 = vst.msk [vmem:[#allocation4 + $0x10] sm:$0xff] %vm747_vm6, %v738_v31 }
 0x334   : > { %v1127_v32 = vpop.f32.mrf.mxu1 }
 0x335   : > { %856 = vst.msk [vmem:[#allocation5 + $0x18] sm:$0xff] %vm747_vm6, %v1127_v32 }
 0x336   : > { %v844_v33 = vpop.f32.mrf.mxu1 }
 0x337   : > { %855 = vst.msk [vmem:[#allocation5 + $0x10] sm:$0xff] %vm747_vm6, %v844_v33 }
 0x338 PF: > { %p1032_p7 = scmp.ne.s32.totalorder %s1181_s24, 1 }
 0x33a   : > { %859 = sbr.rel (%p1032_p7) target bundleno = 976 (0x3d0), region = 64 }
 0x33f   : > { %v862_v34 = vld [vmem:[#allocation4 + $0x10] sm:$0xff]  ;;  %v860_v35 = vld [vmem:[#allocation4] sm:$0xff]  ;;  %v1195_v36 = vmov 0   ;;  %v863_v37 = vld [vmem:[#allocation4 + $0x18] sm:$0xff] }
 0x340   : > { %1166 = vset.pattern.permute.xlu1 %v1195_v36  ;;  %1165 = vset.pattern.permute.xlu0 %v1195_v36  ;;  %v861_v38 = vld [vmem:[#allocation4 + $0x8] sm:$0xff]  ;;  %v888_v40 = vld [vmem:[#allocation5] sm:$0xff]  ;;  %v891_v41 = vld [vmem:[#allocation5 + $0x18] sm:$0xff] }
 0x341   : > { %876 = vperm.xlu1 %1166, %v862_v34   ;;  %866 = vperm.xlu0 %1165, %v860_v35   ;;  %v889_v39 = vld [vmem:[#allocation5 + $0x8] sm:$0xff]  ;;  %v890_v42 = vld [vmem:[#allocation5 + $0x10] sm:$0xff] }
 0x345   : > { %881 = vperm.xlu1 %1166, %v863_v37   ;;  %871 = vperm.xlu0 %1165, %v861_v38  }
 0x349   : > { %899 = vperm.xlu1 %1166, %v889_v39   ;;  %894 = vperm.xlu0 %1165, %v888_v40  }
 0x34d   : > { %909 = vperm.xlu1 %1166, %v891_v41   ;;  %904 = vperm.xlu0 %1165, %v890_v42  }
 0x3bc   : > { %v877_v43 = vpop.permute.xlu1 %876  ;;  %v867_v44 = vpop.permute.xlu0 %866 }
 0x3bd   : > { %v884_v47 = vmul.f32 %v867_v44, %v1285_v14  ;;  %v886_v53 = vmul.f32 %v877_v43, %v1283_v12 }
 0x3c0   : > { %v882_v45 = vpop.permute.xlu1 %881  ;;  %v872_v46 = vpop.permute.xlu0 %871 }
 0x3c1   : > { %v885_v48 = vmul.f32 %v872_v46, %v1289_v20  ;;  %v887_v54 = vmul.f32 %v882_v45, %v1287_v17 }
 0x3c4   : > { %v900_v49 = vpop.permute.xlu1 %899  ;;  %v895_v50 = vpop.permute.xlu0 %894 }
 0x3c5   : > { %v913_v51 = vadd.f32 %v900_v49, %v885_v48  ;;  %v912_v52 = vadd.f32 %v895_v50, %v884_v47 }
 0x3c7   : > { %v917_v55 = vmax.f32 %v913_v51, 0.0  ;;  %v916_v56 = vmax.f32 %v912_v52, 0.0 }
 0x3c8   : > { %v910_v57 = vpop.permute.xlu1 %909  ;;  %v905_v58 = vpop.permute.xlu0 %904 }
 0x3c9   : > { %v1050_v59 = vpack.c.bf16 %v917_v55, %v916_v56  ;;  %v915_v60 = vadd.f32 %v910_v57, %v887_v54  ;;  %v914_v61 = vadd.f32 %v905_v58, %v886_v53 }
 0x3cb   : > { %1051 = vst [vmem:[%s1371_s7] sm:$0xff] %v1050_v59   ;;  %v919_v14 = vmax.f32 %v915_v60, 0.0  ;;  %v918_v20 = vmax.f32 %v914_v61, 0.0 }
 0x3cd   : > { %v1055_v62 = vpack.c.bf16 %v919_v14, %v918_v20 }
 0x3cf   : > { %1057 = vst [vmem:[%s1371_s7 + $0x8] sm:$0xff] %v1055_v62  }
 0x3d0 PF: > { %s17_s26 = sadd.s32 1, %s1189_s26   ;;  %s1372_s24 = smov %s1185_s25 }
 0x3d1   : > { %p14_p8 = scmp.ge.s32.totalorder %s17_s26, 4   ;;  %s1373_s25 = smov %s1375_s27 }
 0x3d3   :  { %16 = sbr.rel (!%p14_p8) target bundleno = 2 (0x2), region = 94 }

// kernel: decoder_forward.5
= control target key start
LH: loop header
LB: loop body
LE: loop exit
PB: predicated region body
PF: predicated region fallthrough
CT: control target
= control target key end

     0   :  { %s1061_s24 = smov 0   ;;  %s1063_s25 = smov 0   ;;  %s1146_s0 = inlined_call_operand.vmem [shape: bf16[32,128], index: 0, kind: input, shape index: {}]   ;;  %s1147_s1 = inlined_call_operand.vmem [shape: bf16[16,32], index: 1, kind: input, shape index: {}]   ;;  %s1148_s2 = inlined_call_operand.vmem [shape: f32[16,1], index: 2, kind: input, shape index: {}]   ;;  %s1149_s3 = inlined_call_operand.vmem [shape: f32[8,1], index: 3, kind: input, shape index: {}]   ;;  %s1150_s4 = inlined_call_operand.vmem [shape: f32[8,1], index: 4, kind: input, shape index: {}]   ;;  %s1151_s5 = inlined_call_operand.vmem [shape: f32[8,16], index: 5, kind: input, shape index: {}]   ;;  %s1152_s6 = inlined_call_operand.vmem [shape: f32[16,8], index: 6, kind: input, shape index: {}]   ;;  %s1153_s7 = inlined_call_operand.vmem [shape: f32[16,128], index: 7, kind: output, shape index: {}]  }
   0x1   :  { %s1065_s26 = smov 0  }
   0x2 LB: > { %s29_s27 = sadd.s32 1, %s1008_s25  ;;  %p873_p0 = scmp.ge.s32.totalorder %s1012_s26, 1  ;;  %s1012_s26 = sphi %s1065_s26, %s17_s26   ;;  %s1008_s25 = sphi %s1063_s25, %s1155_s25   ;;  %s1004_s24 = sphi %s1061_s24, %s1154_s24  }
   0x3   : > { %p31_p1 = scmp.ge.s32.totalorder %s29_s27, 2  ;;  %p250_p2 = scmp.lt.s32.totalorder %s1012_s26, 3 }
   0x5   : > { %s1157_s27 = smov (%p31_p1, %s29_s27), 0  ;;  %p251_p3 = pnand %p873_p0, %p250_p2 }
   0x6   : > { %p372_p4 = scmp.eq.s32.totalorder (!%p251_p3), %s1004_s24, 0 }
   0x7   : > { %254 = sbr.rel (%p251_p3) target bundleno = 977 (0x3d1), region = 48 }
   0xc   : > { %v975_v0 = vld [vmem:[%s1146_s0 + $0x8] sm:$0xff]   ;;  %v1014_v1 = vmov 0.0   ;;  %v976_v2 = vld [vmem:[%s1146_s0] sm:$0xff]   ;;  %vm1015_vm0 = vmmov 0   ;;  %v1016_v4 = vmov 0   ;;  %vm327_vm1 = vcmask 261120  }
   0xd   : > { %911 = vmatprep.subr.bf16.mxu0 %v1014_v1  ;;  %915 = vmatprep.mubr.msk.bf16.mxu0 %vm1015_vm0, %v1014_v1  ;;  %v298_v3 = vld [vmem:[%s1148_s2] sm:$0xff]  ;;  %v299_v6 = vld [vmem:[%s1148_s2 + $0x8] sm:$0xff]  ;;  %vm378_vm2 = vcmask (%p372_p4), 7168   ;;  %v1017_v15 = vmov (%p372_p4), 0.0  }
   0xe   : > { %912 = vmatpush3.bf16.msra.mxu0 %v975_v0  ;;  %974 = vset.pattern.permute.xlu0 %v1016_v4  ;;  %v977_v5 = vld [vmem:[%s1147_s1] sm:$0xff]   ;;  %379 = vst.msk [vmem:[#allocation2] sm:$0xff] (%p372_p4), %vm378_vm2, %v1017_v15  ;;  %380 = vst.msk [vmem:[#allocation2 + $0x8] sm:$0xff] (%p372_p4), %vm378_vm2, %v1017_v15 }
   0xf   : > { %913 = vmatprep.subr.bf16.mxu0 %v1014_v1  ;;  %302 = vperm.xlu0 %974, %v298_v3   ;;  %381 = vst.msk [vmem:[#allocation3] sm:$0xff] (%p372_p4), %vm378_vm2, %v1017_v15  ;;  %382 = vst.msk [vmem:[#allocation3 + $0x8] sm:$0xff] (%p372_p4), %vm378_vm2, %v1017_v15 }
  0x12   : > { %914 = vmatpush3.bf16.msra.mxu0 %v976_v2 }
  0x13   : > { %307 = vperm.xlu0 %974, %v299_v6  }
  0x15   : > { %916 = vmatmul.mubr.msk.bf16.vlgmr.msra.gmra.mxu0 %vm327_vm1, %v977_v5 }
  0x8a   : > { %v303_v7 = vpop.permute.xlu0 %302 }
  0x8e   : > { %v308_v11 = vpop.permute.xlu0 %307 }
  0xd5   : > { %v365_v8 = vpop.f32.mrf.mxu0 }
  0xd6   : > { %v1097_v9 = vadd.f32 %v365_v8, %v303_v7 }
  0xd7   : > { %v917_v10 = vpop.f32.mrf.mxu0  ;;  %377 = sbr.rel (!%p372_p4) target bundleno = 220 (0xdc), region = 52 }
  0xd9   : > { %v368_v12 = vpop.f32.mrf.mxu0 }
  0xda   : > { %v1099_v13 = vadd.f32 %v368_v12, %v308_v11 }
  0xdb   : > { %v918_v14 = vpop.f32.mrf.mxu0 }
  0xdc PF: > { %p879_p5 = scmp.ne.s32.totalorder %s1004_s24, 0 }
  0xde   : > { %385 = sbr.rel (%p879_p5) target bundleno = 374 (0x176), region = 56 }
  0xe3   : > { %396 = vadd.xlane.f32.xlu0 %v1097_v9  ;;  %v407_v16 = vmul.f32 %v1097_v9, %v1097_v9  ;;  %v408_v17 = vmul.f32 %v1099_v13, %v1099_v13  ;;  %v394_v18 = vld [vmem:[#allocation2] sm:$0xff]  ;;  %vm402_vm3 = vcmask 7168   ;;  %v405_v20 = vld [vmem:[#allocation3] sm:$0xff]  ;;  %v395_v23 = vld [vmem:[#allocation2 + $0x8] sm:$0xff] }
  0xe4   : > { %v406_v26 = vld [vmem:[#allocation3 + $0x8] sm:$0xff] }
  0xe5   : > { %409 = vadd.xlane.f32.xlu1 %v407_v16 }
  0xe7   : > { %398 = vadd.xlane.f32.xlu0 %v1099_v13 }
  0xe9   : > { %411 = vadd.xlane.f32.xlu1 %v408_v17 }
 0x16c   : > { %v397_v19 = vpop.xlane.xlu0 %396 }
 0x16d   : > { %v400_v21 = vadd.f32 %v397_v19, %v394_v18 }
 0x16e   : > { %v410_v22 = vpop.xlane.xlu1 %409 }
 0x16f   : > { %403 = vst.msk [vmem:[#allocation2] sm:$0xff] %vm402_vm3, %v400_v21  ;;  %v413_v24 = vadd.f32 %v410_v22, %v405_v20 }
 0x170   : > { %v399_v25 = vpop.xlane.xlu0 %398 }
 0x171   : > { %415 = vst.msk [vmem:[#allocation3] sm:$0xff] %vm402_vm3, %v413_v24  ;;  %v401_v27 = vadd.f32 %v399_v25, %v395_v23 }
 0x172   : > { %v412_v28 = vpop.xlane.xlu1 %411 }
 0x173   : > { %404 = vst.msk [vmem:[#allocation2 + $0x8] sm:$0xff] %vm402_vm3, %v401_v27  ;;  %v414_v29 = vadd.f32 %v412_v28, %v406_v26 }
 0x175   : > { %416 = vst.msk [vmem:[#allocation3 + $0x8] sm:$0xff] %vm402_vm3, %v414_v29 }
 0x176 PF: > { %p417_p6 = scmp.eq.s32.totalorder %s1004_s24, 1 }
 0x177   : > { %v1018_v32 = vmov (%p417_p6), 0.0   ;;  %v423_v33 = vld [vmem:[#allocation2] sm:$0xff] (%p417_p6)  ;;  %vm425_vm4 = vcmask (%p417_p6), 130048   ;;  %vm1019_vm5 = vmmov (%p417_p6), 0   ;;  %vm586_vm6 = vcmask (%p417_p6), 64512   ;;  %v585_v51 = vld [vmem:[%s1152_s6 + $0x8] sm:$0xff] (%p417_p6) }
 0x178   : > { %421 = sbr.rel (!%p417_p6) target bundleno = 803 (0x323), region = 60  ;;  %919 = vmatprep.subr.mxu0 (%p417_p6), %v1018_v32  ;;  %926 = vmatprep.subr.mxu1 (%p417_p6), %v1018_v32  ;;  %v499_v34 = vld [vmem:[#allocation3] sm:$0xff] (%p417_p6)  ;;  %v422_v35 = vld [vmem:[%s1151_s5] sm:$0xff] (%p417_p6)  ;;  %vm668_vm7 = vcmask (%p417_p6), 7168  }
 0x179   : > { %923 = vmatprep.mubr.msk.f32.mxu0 (%p417_p6), %vm1019_vm5, %v1018_v32  ;;  %930 = vmatprep.mubr.msk.f32.mxu1 (%p417_p6), %vm1019_vm5, %v1018_v32  ;;  %v584_v36 = vld [vmem:[%s1152_s6] sm:$0xff] (%p417_p6) }
 0x17a   : > { %v424_v30 = vld [vmem:[#allocation2 + $0x8] sm:$0xff] (%p417_p6)  ;;  %v579_v47 = vld [vmem:[%s1149_s3] sm:$0xff] (%p417_p6) }
 0x17b   : > { %920 = vmatpush3.msra.mxu0 (%p417_p6), %v424_v30  ;;  %v581_v50 = vld [vmem:[%s1150_s4] sm:$0xff] (%p417_p6) }
 0x17c   : > { %v500_v31 = vld [vmem:[#allocation3 + $0x8] sm:$0xff] (%p417_p6)  ;;  %921 = vmatprep.subr.mxu0 (%p417_p6), %v1018_v32 }
 0x17d   : > { %927 = vmatpush3.msra.mxu1 %v500_v31  ;;  %922 = vmatpush3.msra.mxu0 %v423_v33 }
 0x17e   : > { %928 = vmatprep.subr.mxu1 %v1018_v32  ;;  %924 = vmatmul.mubr.msk.f32.vlgmr.msra.gmra.mxu0 %vm425_vm4, %v422_v35 }
 0x17f   : > { %929 = vmatpush3.msra.mxu1 %v499_v34  ;;  %935 = vmatprep.mubr.msk.f32.mxu0 %vm586_vm6, %v584_v36 }
 0x180   : > { %931 = vmatmul.mubr.msk.f32.vlgmr.msra.gmra.mxu1 %vm425_vm4, %v422_v35 }
 0x181   : > { %940 = vmatprep.mubr.msk.f32.mxu1 %vm586_vm6, %v584_v36 }
 0x23e   : > { %v495_v37 = vpop.f32.mrf.mxu0 }
 0x23f   : > { %v572_v39 = vmul.f32 0.001953125, %v495_v37 }
 0x240   : > { %v567_v38 = vpop.f32.mrf.mxu1  ;;  %v925_v41 = vpop.f32.mrf.mxu0 }
 0x241   : > { %v573_v40 = vmul.f32 0.001953125, %v567_v38  ;;  %v574_v43 = vmul.f32 %v572_v39, %v572_v39 }
 0x242   : > { %v932_v42 = vpop.f32.mrf.mxu1 }
 0x243   : > { %v575_v44 = vsub.f32 %v573_v40, %v574_v43 }
 0x245   : > { %v576_v45 = vmax.f32 %v575_v44, 0.0 }
 0x247   : > { %v577_v46 = vadd.f32 1e-05, %v576_v45 }
 0x249   : > { %978 = vrsqrt.f32 %v577_v46 }
 0x256   : > { %v979_v48 = vpop.eup %978 }
 0x257   : > { %v580_v49 = vmul.f32 %v979_v48, %v579_v47 }
 0x259   : > { %933 = vmatprep.subr.mxu0 %v580_v49  ;;  %v582_v52 = vmul.f32 %v580_v49, %v572_v39 }
 0x25a   : > { %934 = vmatpush3.msra.mxu0 %v580_v49 }
 0x25b   : > { %v583_v53 = vsub.f32 %v581_v50, %v582_v52  ;;  %936 = vmatmul.mubr.msk.f32.vlgmr.msra.gmra.mxu0 %vm586_vm6, %v585_v51 }
 0x25d   : > { %938 = vmatprep.subr.mxu1 %v583_v53 }
 0x25e   : > { %939 = vmatpush3.msra.mxu1 %v583_v53 }
 0x25f   : > { %941 = vmatmul.mubr.msk.f32.vlgmr.msra.gmra.mxu1 %vm586_vm6, %v585_v51 }
 0x31b   : > { %v937_v54 = vpop.f32.mrf.mxu0 }
 0x31c   : > { %670 = vst.msk [vmem:[#allocation4 + $0x8] sm:$0xff] %vm668_vm7, %v937_v54 }
 0x31d   : > { %v659_v55 = vpop.f32.mrf.mxu0 }
 0x31e   : > { %669 = vst.msk [vmem:[#allocation4] sm:$0xff] %vm668_vm7, %v659_v55 }
 0x31f   : > { %v942_v56 = vpop.f32.mrf.mxu1 }
 0x320   : > { %755 = vst.msk [vmem:[#allocation5 + $0x8] sm:$0xff] %vm668_vm7, %v942_v56 }
 0x321   : > { %v745_v57 = vpop.f32.mrf.mxu1 }
 0x322   : > { %754 = vst.msk [vmem:[#allocation5] sm:$0xff] %vm668_vm7, %v745_v57 }
 0x323 PF: > { %p887_p7 = scmp.ne.s32.totalorder %s1004_s24, 1 }
 0x325   : > { %758 = sbr.rel (%p887_p7) target bundleno = 977 (0x3d1), region = 64 }
 0x32a   : > { %v773_v58 = vld [vmem:[#allocation5] sm:$0xff]  ;;  %v759_v59 = vld [vmem:[#allocation4] sm:$0xff]  ;;  %v1020_v60 = vmov 0   ;;  %v774_v61 = vld [vmem:[#allocation5 + $0x8] sm:$0xff] }
 0x32b   : > { %981 = vset.pattern.permute.xlu1 %v1020_v60  ;;  %980 = vset.pattern.permute.xlu0 %v1020_v60  ;;  %v760_v62 = vld [vmem:[#allocation4 + $0x8] sm:$0xff] }
 0x32c   : > { %777 = vperm.xlu1 %981, %v773_v58   ;;  %763 = vperm.xlu0 %980, %v759_v59  }
 0x330   : > { %782 = vperm.xlu1 %981, %v774_v61   ;;  %768 = vperm.xlu0 %980, %v760_v62  }
 0x3a7   : > { %v778_v63 = vpop.permute.xlu1 %777  ;;  %v764_v0 = vpop.permute.xlu0 %763 }
 0x3a8   : > { %v771_v1 = vmul.f32 %v764_v0, %v1097_v9 }
 0x3aa   : > { %v785_v2 = vadd.f32 %v778_v63, %v771_v1 }
 0x3ab   : > { %v769_v3 = vpop.permute.xlu0 %768  ;;  %v783_v6 = vpop.permute.xlu1 %782 }
 0x3ac   : > { %v888_v4 = vmul.f32 -1.442695, %v785_v2  ;;  %v772_v5 = vmul.f32 %v769_v3, %v1099_v13 }
 0x3ae   : > { %982 = vpow2.f32 %v888_v4  ;;  %v786_v7 = vadd.f32 %v783_v6, %v772_v5 }
 0x3b0   : > { %v889_v8 = vmul.f32 -1.442695, %v786_v7 }
 0x3b2   : > { %984 = vpow2.f32 %v889_v8 }
 0x3bb   : > { %v983_v10 = vpop.eup %982 }
 0x3bc   : > { %v793_v11 = vadd.f32 1.0, %v983_v10 }
 0x3be   : > { %986 = vrcp.f32 %v793_v11 }
 0x3bf   : > { %v985_v12 = vpop.eup %984 }
 0x3c0   : > { %v794_v14 = vadd.f32 1.0, %v985_v12 }
 0x3c2   : > { %988 = vrcp.f32 %v794_v14 }
 0x3cb   : > { %v987_v15 = vpop.eup %986 }
 0x3cc   : > { %799 = vst [vmem:[%s1153_s7] sm:$0xff] %v987_v15 }
 0x3cf   : > { %v989_v9 = vpop.eup %988 }
 0x3d0   : > { %800 = vst [vmem:[%s1153_s7 + $0x8] sm:$0xff] %v989_v9 }
 0x3d1 PF: > { %s17_s26 = sadd.s32 1, %s1012_s26   ;;  %s1154_s24 = smov %s1008_s25 }
 0x3d2   : > { %p14_p8 = scmp.ge.s32.totalorder %s17_s26, 4   ;;  %s1155_s25 = smov %s1157_s27 }
 0x3d4   :  { %16 = sbr.rel (!%p14_p8) target bundleno = 2 (0x2), region = 94 }

</bundles_post_ra>
